<compile_context>
chip_gen: v6e
topology: v6e:2x2x1
jax: 0.10.0
libtpu: 0.0.40
codegen_flags: <defaults>
</compile_context>

<pallas_src>
import jax
import jax.numpy as jnp
from jax.experimental import pallas as pl
from jax.experimental.pallas import tpu as pltpu

_LANE = 128


# ------------------------- small helpers -------------------------

def _round_up(n, m):
    return (n + m - 1) // m * m


def _elu(x):
    # ELU(alpha=1): x if x>0 else exp(x)-1 (the dead branch is selected away, never NaN).
    return jnp.where(x > 0, x, jnp.exp(x) - 1.0)


def _l2_normalize_rsqrt(x, eps=1e-12):
    # F.normalize(x, dim=-1) == x / max(||x||, eps) == x * rsqrt(max(||x||^2, eps^2))
    ss = jnp.sum(x * x, axis=-1, keepdims=True)
    return x * jax.lax.rsqrt(jnp.maximum(ss, eps * eps))


def _l2_normalize_ref(x, eps=1e-12):
    n = jnp.sqrt(jnp.sum(x * x, axis=-1, keepdims=True))
    return x / jnp.maximum(n, eps)


def _pad2d(x, rows, cols):
    r, c = x.shape
    if r == rows and c == cols:
        return x
    return jnp.pad(x, ((0, rows - r), (0, cols - c)))


def _pad_rows(x, n_pad):
    n = x.shape[0]
    if n == n_pad:
        return x
    return jnp.concatenate([x, jnp.zeros((n_pad - n,) + x.shape[1:], x.dtype)], axis=0)


# ------------------------------ kernel ---------------------------------

def fused_dual_mlp_kernel(s_ref, t_ref, sign_ref,
                          ws1_ref, bs1_ref, ws2_ref, bs2_ref,
                          wt1_ref, bt1_ref, wt2_ref, bt2_ref,
                          o_ref):
    """out = sign * (normalize(mlp_t(textual)) + normalize(mlp_s(structural))).

    mlp_*: fc1 -> ELU -> fc2 -> L2-normalize (the SKA `MLP` module).
    Output feature dims are zero-padded to a multiple of 128 (lane-dense stores);
    `sign` is +-1 per row (inverse relations get -1, everything else +1).
    """
    # structural path (f32)
    s = s_ref[...]
    hs = _elu(jnp.dot(s, ws1_ref[...], preferred_element_type=jnp.float32) + bs1_ref[...])
    ys = _l2_normalize_rsqrt(
        jnp.dot(hs, ws2_ref[...], preferred_element_type=jnp.float32) + bs2_ref[...])

    # textual path (dominant 768x384 matmul in bf16, f32 accumulation)
    t = t_ref[...]
    ht = _elu(jnp.dot(t, wt1_ref[...], preferred_element_type=jnp.float32) + bt1_ref[...])
    yt = _l2_normalize_rsqrt(
        jnp.dot(ht, wt2_ref[...], preferred_element_type=jnp.float32) + bt2_ref[...])

    o_ref[...] = sign_ref[...] * (ys + yt)


# --------------------------- pallas wrapper -----------------------------

def _prepare_fused_mlp_operands(params):
    """Zero-pad sub-128-lane output dims of the MLP weights; cast wt1 to bf16."""
    emb = params["ws1"].shape[0]            # emb_dim (fc1 input of mlp_s)
    hid_s = params["ws1"].shape[1]          # emb_dim // 2
    hid_t = params["wt1"].shape[1]          # plm_dim // 2 (already a multiple of 128)
    hid_s_p = _round_up(hid_s, _LANE)
    out_p = _round_up(emb, _LANE)
    weights = (
        _pad2d(params["ws1"], emb, hid_s_p),
        _pad2d(params["bs1"], 1, hid_s_p),
        _pad2d(params["ws2"], hid_s_p, out_p),
        _pad2d(params["bs2"], 1, out_p),
        params["wt1"].astype(jnp.bfloat16),
        params["bt1"],
        _pad2d(params["wt2"], hid_t, out_p),
        _pad2d(params["bt2"], 1, out_p),
    )
    return weights, out_p, emb


def fused_dual_mlp(s, t, sign, params, tile_m=512):
    """Run sign * (mlp_s(s) + mlp_t(t)) (both L2-normalized) for all rows in one pallas_call."""
    N, Ds = s.shape
    Dt = t.shape[1]
    weights, out_p, emb = _prepare_fused_mlp_operands(params)

    tm = min(tile_m, _round_up(N, 8))
    n_pad = _round_up(N, tm)
    s = _pad_rows(s, n_pad)
    t = _pad_rows(t.astype(jnp.bfloat16), n_pad)
    sign = _pad_rows(sign.astype(jnp.float32).reshape(-1, 1), n_pad)

    row_spec = lambda d: pl.BlockSpec((tm, d), lambda i: (i, 0))
    const_spec = lambda w: pl.BlockSpec(w.shape, lambda i: (0, 0))  # resident across grid steps

    out = pl.pallas_call(
        fused_dual_mlp_kernel,
        grid=(n_pad // tm,),
        in_specs=[row_spec(Ds), row_spec(Dt), row_spec(1)]
                 + [const_spec(w) for w in weights],
        out_specs=pl.BlockSpec((tm, out_p), lambda i: (i, 0)),
        out_shape=jax.ShapeDtypeStruct((n_pad, out_p), jnp.float32),
        compiler_params=pltpu.CompilerParams(dimension_semantics=("parallel",)),
    )(s, t, sign, *weights)

    return out[:N, :emb]


# --------------------------- parameter setup -----------------------------

def init_params(key, num_entities, num_rels, num_types, emb_dim, plm_dim):
    ks = jax.random.split(key, 20)

    def uni(k, shape, r):
        return jax.random.uniform(k, shape, jnp.float32, -r, r)

    def linear(kw, kb, fan_in, fan_out):
        r = 1.0 / jnp.sqrt(jnp.float32(fan_in))
        w = uni(kw, (fan_in, fan_out), r)          # stored [in, out]
        b = uni(kb, (1, fan_out), r)               # kept 2-D for TPU layout
        return w, b

    # embeddings (SKA._init_*_embedding)
    r_ent = jnp.sqrt(6.0) / jnp.sqrt(jnp.float32(num_entities + emb_dim))
    r_rel = jnp.sqrt(6.0) / jnp.sqrt(jnp.float32(num_rels + emb_dim))
    r_typ = jnp.sqrt(6.0) / jnp.sqrt(jnp.float32(num_types + emb_dim))
    entity_embs = uni(ks[0], (num_entities, emb_dim), r_ent)
    relation_embs = uni(ks[1], (num_rels, emb_dim), r_rel)
    relation_embs = relation_embs / jnp.maximum(
        jnp.linalg.norm(relation_embs, axis=1, keepdims=True), 1e-12)
    type_embs = uni(ks[2], (num_types, emb_dim), r_typ)

    # "pretrained" PLM embeddings (synthetic, deterministic)
    pre_ent = 0.02 * jax.random.normal(ks[3], (num_entities, plm_dim), jnp.float32)
    pre_rel = 0.02 * jax.random.normal(ks[4], (num_rels, plm_dim), jnp.float32)
    pre_type = 0.02 * jax.random.normal(ks[5], (num_types, plm_dim), jnp.float32)

    # mlp_s : emb_dim -> emb_dim//2 -> emb_dim
    ws1, bs1 = linear(ks[6], ks[7], emb_dim, emb_dim // 2)
    ws2, bs2 = linear(ks[8], ks[9], emb_dim // 2, emb_dim)
    # mlp_t : plm_dim -> plm_dim//2 -> emb_dim
    wt1, bt1 = linear(ks[10], ks[11], plm_dim, plm_dim // 2)
    wt2, bt2 = linear(ks[12], ks[13], plm_dim // 2, emb_dim)
    # decoder : emb_dim -> num_types
    wd, bd = linear(ks[14], ks[15], emb_dim, num_types)

    return dict(entity_embs=entity_embs, relation_embs=relation_embs, type_embs=type_embs,
                pre_ent=pre_ent, pre_rel=pre_rel, pre_type=pre_type,
                ws1=ws1, bs1=bs1, ws2=ws2, bs2=bs2,
                wt1=wt1, bt1=bt1, wt2=wt2, bt2=bt2,
                wd=wd, bd=bd)


# ------------------------------ forward ----------------------------------

def ska_forward(params, et_content, kg_content, num_entities, num_rels):
    """SKA.forward base path (two_hop_et_content is None)."""
    B, Ne, _ = et_content.shape
    _, Nk, _ = kg_content.shape
    emb_dim = params["type_embs"].shape[1]
    n_et = B * Ne
    n_kg = B * Nk

    # --- embedding gathers (glue, plain JAX) ---
    et_type_ids = et_content[:, :, 2].reshape(-1) - num_entities
    kg_ent_ids = kg_content[:, :, 2].reshape(-1)
    kg_rel_ids = kg_content[:, :, 1].reshape(-1)
    rel_mod = kg_rel_ids % num_rels

    # Concatenate all three row sets -> single fused Pallas call (weights DMA'd once).
    s_all = jnp.concatenate([params["type_embs"][et_type_ids],
                             params["entity_embs"][kg_ent_ids],
                             params["relation_embs"][rel_mod]], axis=0)
    t_all = jnp.concatenate([params["pre_type"][et_type_ids],
                             params["pre_ent"][kg_ent_ids],
                             params["pre_rel"][rel_mod]], axis=0)

    # Inverse-relation sign flip fused into the kernel epilogue (+1 for et/entity rows).
    rel_sign = jnp.where(kg_rel_ids >= num_rels, -1.0, 1.0).astype(jnp.float32)
    sign_all = jnp.concatenate([jnp.ones((n_et + n_kg,), jnp.float32), rel_sign], axis=0)

    y_all = fused_dual_mlp(s_all, t_all, sign_all, params)   # [n_et + 2*n_kg, emb_dim]

    et_type_embs = y_all[:n_et]
    kg_entity_embs = y_all[n_et:n_et + n_kg]
    kg_relation_embs = y_all[n_et + n_kg:]

    translated = (kg_entity_embs + kg_relation_embs).reshape(B, Nk, emb_dim)
    et_type_embs = et_type_embs.reshape(B, Ne, emb_dim)

    all_embs = jnp.concatenate([translated, et_type_embs], axis=1)
    global_emb = jnp.mean(all_embs, axis=1, keepdims=True)             # [B, 1, emb]

    # predict = cat([decoder(translated), decoder(et_type), decoder(global)], dim=1)
    dec_in = jnp.concatenate([translated, et_type_embs, global_emb], axis=1)

    # decoder + sigmoid: 32x16 matmul, left to XLA (a standalone pallas_call is pure overhead here)
    # TODO(synk): `MHA(5, 1.0)` class is not defined in the reference source; treated as identity before sigmoid.
    logits = dec_in @ params["wd"] + params["bd"].reshape(-1)
    return jax.nn.sigmoid(logits)


# --------------------------- pure-JAX reference ---------------------------

def ska_forward_ref(params, et_content, kg_content, num_entities, num_rels):
    def mlp(x, w1, b1, w2, b2):
        h = _elu(x @ w1 + b1)
        return _l2_normalize_ref(h @ w2 + b2)

    def dual(s, t, sign, p):
        ys = mlp(s, p["ws1"], p["bs1"], p["ws2"], p["bs2"])
        yt = mlp(t, p["wt1"], p["bt1"], p["wt2"], p["bt2"])
        return sign * (yt + ys)

    B, Ne, _ = et_content.shape
    _, Nk, _ = kg_content.shape
    emb_dim = params["type_embs"].shape[1]
    mlp_p = {k: params[k] for k in ("ws1", "bs1", "ws2", "bs2", "wt1", "bt1", "wt2", "bt2")}

    et_ids = et_content[:, :, 2].reshape(-1) - num_entities
    et_e = dual(params["type_embs"][et_ids], params["pre_type"][et_ids],
                jnp.ones((B * Ne, 1), jnp.float32), mlp_p)

    ent_ids = kg_content[:, :, 2].reshape(-1)
    ent_e = dual(params["entity_embs"][ent_ids], params["pre_ent"][ent_ids],
                 jnp.ones((B * Nk, 1), jnp.float32), mlp_p)

    rel_ids = kg_content[:, :, 1].reshape(-1)
    rel_mod = rel_ids % num_rels
    sign = jnp.where(rel_ids >= num_rels, -1.0, 1.0).astype(jnp.float32).reshape(-1, 1)
    rel_e = dual(params["relation_embs"][rel_mod], params["pre_rel"][rel_mod], sign, mlp_p)

    translated = (ent_e + rel_e).reshape(B, Nk, emb_dim)
    et_e = et_e.reshape(B, Ne, emb_dim)
    global_emb = jnp.mean(jnp.concatenate([translated, et_e], axis=1), axis=1, keepdims=True)
    dec_in = jnp.concatenate([translated, et_e, global_emb], axis=1)
    logits = dec_in @ params["wd"] + params["bd"].reshape(-1)
    return jax.nn.sigmoid(logits)


# ------------------------------- main -------------------------------------

if __name__ == "__main__":
    num_entities, num_rels, num_types = 50, 10, 16
    emb_dim, plm_dim = 32, 768           # 'bert-base-uncased' -> 768
    B, Ne, Nk = 2, 4, 4                  # batch, sample_et_size, sample_kg_size

    key = jax.random.PRNGKey(0)
    kp, k_et, k_kg_e, k_kg_r = jax.random.split(key, 4)
    params = init_params(kp, num_entities, num_rels, num_types, emb_dim, plm_dim)

    # et_content[:, :, 2] holds type ids offset by num_entities
    et_type = jax.random.randint(k_et, (B, Ne), num_entities, num_entities + num_types)
    et_content = jnp.stack([jnp.zeros_like(et_type), jnp.zeros_like(et_type), et_type],
                           axis=-1).astype(jnp.int32)

    # kg_content[:, :, 1] = relation id in [0, 2*num_rels) (>=num_rels -> inverse), [:, :, 2] = entity id
    kg_ent = jax.random.randint(k_kg_e, (B, Nk), 0, num_entities)
    kg_rel = jax.random.randint(k_kg_r, (B, Nk), 0, 2 * num_rels)
    kg_content = jnp.stack([jnp.zeros_like(kg_ent), kg_rel, kg_ent], axis=-1).astype(jnp.int32)

    out = ska_forward(params, et_content, kg_content, num_entities, num_rels)
    out = jax.block_until_ready(out)

    ref = ska_forward_ref(params, et_content, kg_content, num_entities, num_rels)
    assert out.shape == (B, Nk + Ne + 1, num_types), out.shape
    # bf16 is used for the 768x384 matmul (f32 accumulation), so tolerance is loosened vs pure f32.
    assert jnp.allclose(out, ref, rtol=2e-2, atol=2e-2), float(jnp.max(jnp.abs(out - ref)))

    print("KERNEL_OK")
</pallas_src>

<mosaic_0001>
module attributes {stable_mosaic.version = 11 : i64} {
  func.func @fused_dual_mlp_kernel(%arg0: i32, %arg1: memref<24x32xf32, #tpu.memory_space<vmem>>, %arg2: memref<24x768xbf16, #tpu.memory_space<vmem>>, %arg3: memref<24x1xf32, #tpu.memory_space<vmem>>, %arg4: memref<32x128xf32, #tpu.memory_space<vmem>>, %arg5: memref<1x128xf32, #tpu.memory_space<vmem>>, %arg6: memref<128x128xf32, #tpu.memory_space<vmem>>, %arg7: memref<1x128xf32, #tpu.memory_space<vmem>>, %arg8: memref<768x384xbf16, #tpu.memory_space<vmem>>, %arg9: memref<1x384xf32, #tpu.memory_space<vmem>>, %arg10: memref<384x128xf32, #tpu.memory_space<vmem>>, %arg11: memref<1x128xf32, #tpu.memory_space<vmem>>, %arg12: memref<24x128xf32, #tpu.memory_space<vmem>>) attributes {dimension_semantics = [#tpu.dimension_semantics<parallel>], iteration_bounds = array<i64: 1>, scalar_prefetch = 0 : i64, scratch_operands = 0 : i64, tpu.core_type = #tpu.core_type<tc>, window_params = [{transform_indices = @transform_0, window_bounds = array<i64: 24, 32>}, {transform_indices = @transform_1, window_bounds = array<i64: 24, 768>}, {transform_indices = @transform_2, window_bounds = array<i64: 24, 1>}, {pipeline_mode = #tpu.pipeline_mode<synchronous>, transform_indices = @transform_3, window_bounds = array<i64: 32, 128>}, {pipeline_mode = #tpu.pipeline_mode<synchronous>, transform_indices = @transform_4, window_bounds = array<i64: 1, 128>}, {pipeline_mode = #tpu.pipeline_mode<synchronous>, transform_indices = @transform_5, window_bounds = array<i64: 128, 128>}, {pipeline_mode = #tpu.pipeline_mode<synchronous>, transform_indices = @transform_6, window_bounds = array<i64: 1, 128>}, {pipeline_mode = #tpu.pipeline_mode<synchronous>, transform_indices = @transform_7, window_bounds = array<i64: 768, 384>}, {pipeline_mode = #tpu.pipeline_mode<synchronous>, transform_indices = @transform_8, window_bounds = array<i64: 1, 384>}, {pipeline_mode = #tpu.pipeline_mode<synchronous>, transform_indices = @transform_9, window_bounds = array<i64: 384, 128>}, {pipeline_mode = #tpu.pipeline_mode<synchronous>, transform_indices = @transform_10, window_bounds = array<i64: 1, 128>}, {transform_indices = @transform_11, window_bounds = array<i64: 24, 128>}]} {
    %c0 = arith.constant 0 : index
    %c0_0 = arith.constant 0 : index
    %0 = vector.load %arg1[%c0, %c0_0] : memref<24x32xf32, #tpu.memory_space<vmem>>, vector<24x32xf32>
    %c0_1 = arith.constant 0 : index
    %c0_2 = arith.constant 0 : index
    %1 = vector.load %arg4[%c0_1, %c0_2] : memref<32x128xf32, #tpu.memory_space<vmem>>, vector<32x128xf32>
    %cst = arith.constant dense<0.000000e+00> : vector<24x128xf32>
    %2 = tpu.matmul %0, %1, %cst {dimension_numbers = #tpu.dot_dimension_numbers<[1], [0], [0], [1], [0, 0, 1, 1], [], []>} : vector<24x32xf32>, vector<32x128xf32>, vector<24x128xf32> -> vector<24x128xf32>
    %c0_3 = arith.constant 0 : index
    %c0_4 = arith.constant 0 : index
    %3 = vector.load %arg5[%c0_3, %c0_4] : memref<1x128xf32, #tpu.memory_space<vmem>>, vector<1x128xf32>
    %4 = vector.broadcast %3 : vector<1x128xf32> to vector<24x128xf32>
    %5 = arith.addf %2, %4 : vector<24x128xf32>
    %cst_5 = arith.constant 0.000000e+00 : f32
    %6 = vector.broadcast %cst_5 : f32 to vector<24x128xf32>
    %7 = arith.cmpf ogt, %5, %6 : vector<24x128xf32>
    %8 = math.exp %5 : vector<24x128xf32>
    %cst_6 = arith.constant 1.000000e+00 : f32
    %9 = vector.broadcast %cst_6 : f32 to vector<24x128xf32>
    %10 = arith.subf %8, %9 : vector<24x128xf32>
    %11 = arith.select %7, %5, %10 : vector<24x128xi1>, vector<24x128xf32>
    %c0_7 = arith.constant 0 : index
    %c0_8 = arith.constant 0 : index
    %12 = vector.load %arg6[%c0_7, %c0_8] : memref<128x128xf32, #tpu.memory_space<vmem>>, vector<128x128xf32>
    %cst_9 = arith.constant dense<0.000000e+00> : vector<24x128xf32>
    %13 = tpu.matmul %11, %12, %cst_9 {dimension_numbers = #tpu.dot_dimension_numbers<[1], [0], [0], [1], [0, 0, 1, 1], [], []>} : vector<24x128xf32>, vector<128x128xf32>, vector<24x128xf32> -> vector<24x128xf32>
    %c0_10 = arith.constant 0 : index
    %c0_11 = arith.constant 0 : index
    %14 = vector.load %arg7[%c0_10, %c0_11] : memref<1x128xf32, #tpu.memory_space<vmem>>, vector<1x128xf32>
    %15 = vector.broadcast %14 : vector<1x128xf32> to vector<24x128xf32>
    %16 = arith.addf %13, %15 : vector<24x128xf32>
    %17 = arith.mulf %16, %16 : vector<24x128xf32>
    %cst_12 = arith.constant dense<0.000000e+00> : vector<24xf32>
    %18 = vector.multi_reduction <add>, %17, %cst_12 [1] : vector<24x128xf32> to vector<24xf32>
    %19 = vector.shape_cast %18 : vector<24xf32> to vector<24x1xf32>
    %cst_13 = arith.constant 1.000000e-24 : f32
    %20 = vector.broadcast %cst_13 : f32 to vector<24x1xf32>
    %21 = arith.maximumf %19, %20 : vector<24x1xf32>
    %22 = math.rsqrt %21 : vector<24x1xf32>
    %23 = vector.broadcast %22 : vector<24x1xf32> to vector<24x128xf32>
    %24 = arith.mulf %16, %23 : vector<24x128xf32>
    %c0_14 = arith.constant 0 : index
    %c0_15 = arith.constant 0 : index
    %25 = vector.load %arg2[%c0_14, %c0_15] : memref<24x768xbf16, #tpu.memory_space<vmem>>, vector<24x768xbf16>
    %c0_16 = arith.constant 0 : index
    %c0_17 = arith.constant 0 : index
    %26 = vector.load %arg8[%c0_16, %c0_17] : memref<768x384xbf16, #tpu.memory_space<vmem>>, vector<768x384xbf16>
    %cst_18 = arith.constant dense<0.000000e+00> : vector<24x384xf32>
    %27 = tpu.matmul %25, %26, %cst_18 {dimension_numbers = #tpu.dot_dimension_numbers<[1], [0], [0], [1], [0, 0, 1, 1], [], []>} : vector<24x768xbf16>, vector<768x384xbf16>, vector<24x384xf32> -> vector<24x384xf32>
    %c0_19 = arith.constant 0 : index
    %c0_20 = arith.constant 0 : index
    %28 = vector.load %arg9[%c0_19, %c0_20] : memref<1x384xf32, #tpu.memory_space<vmem>>, vector<1x384xf32>
    %29 = vector.broadcast %28 : vector<1x384xf32> to vector<24x384xf32>
    %30 = arith.addf %27, %29 : vector<24x384xf32>
    %cst_21 = arith.constant 0.000000e+00 : f32
    %31 = vector.broadcast %cst_21 : f32 to vector<24x384xf32>
    %32 = arith.cmpf ogt, %30, %31 : vector<24x384xf32>
    %33 = math.exp %30 : vector<24x384xf32>
    %cst_22 = arith.constant 1.000000e+00 : f32
    %34 = vector.broadcast %cst_22 : f32 to vector<24x384xf32>
    %35 = arith.subf %33, %34 : vector<24x384xf32>
    %36 = arith.select %32, %30, %35 : vector<24x384xi1>, vector<24x384xf32>
    %c0_23 = arith.constant 0 : index
    %c0_24 = arith.constant 0 : index
    %37 = vector.load %arg10[%c0_23, %c0_24] : memref<384x128xf32, #tpu.memory_space<vmem>>, vector<384x128xf32>
    %cst_25 = arith.constant dense<0.000000e+00> : vector<24x128xf32>
    %38 = tpu.matmul %36, %37, %cst_25 {dimension_numbers = #tpu.dot_dimension_numbers<[1], [0], [0], [1], [0, 0, 1, 1], [], []>} : vector<24x384xf32>, vector<384x128xf32>, vector<24x128xf32> -> vector<24x128xf32>
    %c0_26 = arith.constant 0 : index
    %c0_27 = arith.constant 0 : index
    %39 = vector.load %arg11[%c0_26, %c0_27] : memref<1x128xf32, #tpu.memory_space<vmem>>, vector<1x128xf32>
    %40 = vector.broadcast %39 : vector<1x128xf32> to vector<24x128xf32>
    %41 = arith.addf %38, %40 : vector<24x128xf32>
    %42 = arith.mulf %41, %41 : vector<24x128xf32>
    %cst_28 = arith.constant dense<0.000000e+00> : vector<24xf32>
    %43 = vector.multi_reduction <add>, %42, %cst_28 [1] : vector<24x128xf32> to vector<24xf32>
    %44 = vector.shape_cast %43 : vector<24xf32> to vector<24x1xf32>
    %cst_29 = arith.constant 1.000000e-24 : f32
    %45 = vector.broadcast %cst_29 : f32 to vector<24x1xf32>
    %46 = arith.maximumf %44, %45 : vector<24x1xf32>
    %47 = math.rsqrt %46 : vector<24x1xf32>
    %48 = vector.broadcast %47 : vector<24x1xf32> to vector<24x128xf32>
    %49 = arith.mulf %41, %48 : vector<24x128xf32>
    %c0_30 = arith.constant 0 : index
    %c0_31 = arith.constant 0 : index
    %50 = vector.load %arg3[%c0_30, %c0_31] : memref<24x1xf32, #tpu.memory_space<vmem>>, vector<24x1xf32>
    %51 = arith.addf %24, %49 : vector<24x128xf32>
    %52 = vector.broadcast %50 : vector<24x1xf32> to vector<24x128xf32>
    %53 = arith.mulf %52, %51 : vector<24x128xf32>
    %c0_32 = arith.constant 0 : index
    %c0_33 = arith.constant 0 : index
    %54 = vector.load %arg12[%c0_32, %c0_33] : memref<24x128xf32, #tpu.memory_space<vmem>>, vector<24x128xf32>
    tpu.vector_store %arg12[%c0_32, %c0_33], %53 {strides = array<i32>} : memref<24x128xf32, #tpu.memory_space<vmem>>, vector<24x128xf32>,
    return
  }
  func.func @transform_0(%arg0: i32) -> (i32, i32) {
    %c0_i32 = arith.constant 0 : i32
    %c0_i32_0 = arith.constant 0 : i32
    return %arg0, %c0_i32 : i32, i32
  }
  func.func @transform_1(%arg0: i32) -> (i32, i32) {
    %c0_i32 = arith.constant 0 : i32
    %c0_i32_0 = arith.constant 0 : i32
    return %arg0, %c0_i32 : i32, i32
  }
  func.func @transform_2(%arg0: i32) -> (i32, i32) {
    %c0_i32 = arith.constant 0 : i32
    %c0_i32_0 = arith.constant 0 : i32
    return %arg0, %c0_i32 : i32, i32
  }
  func.func @transform_3(%arg0: i32) -> (i32, i32) {
    %c0_i32 = arith.constant 0 : i32
    %c0_i32_0 = arith.constant 0 : i32
    %c0_i32_1 = arith.constant 0 : i32
    return %c0_i32, %c0_i32_0 : i32, i32
  }
  func.func @transform_4(%arg0: i32) -> (i32, i32) {
    %c0_i32 = arith.constant 0 : i32
    %c0_i32_0 = arith.constant 0 : i32
    %c0_i32_1 = arith.constant 0 : i32
    return %c0_i32, %c0_i32_0 : i32, i32
  }
  func.func @transform_5(%arg0: i32) -> (i32, i32) {
    %c0_i32 = arith.constant 0 : i32
    %c0_i32_0 = arith.constant 0 : i32
    %c0_i32_1 = arith.constant 0 : i32
    return %c0_i32, %c0_i32_0 : i32, i32
  }
  func.func @transform_6(%arg0: i32) -> (i32, i32) {
    %c0_i32 = arith.constant 0 : i32
    %c0_i32_0 = arith.constant 0 : i32
    %c0_i32_1 = arith.constant 0 : i32
    return %c0_i32, %c0_i32_0 : i32, i32
  }
  func.func @transform_7(%arg0: i32) -> (i32, i32) {
    %c0_i32 = arith.constant 0 : i32
    %c0_i32_0 = arith.constant 0 : i32
    %c0_i32_1 = arith.constant 0 : i32
    return %c0_i32, %c0_i32_0 : i32, i32
  }
  func.func @transform_8(%arg0: i32) -> (i32, i32) {
    %c0_i32 = arith.constant 0 : i32
    %c0_i32_0 = arith.constant 0 : i32
    %c0_i32_1 = arith.constant 0 : i32
    return %c0_i32, %c0_i32_0 : i32, i32
  }
  func.func @transform_9(%arg0: i32) -> (i32, i32) {
    %c0_i32 = arith.constant 0 : i32
    %c0_i32_0 = arith.constant 0 : i32
    %c0_i32_1 = arith.constant 0 : i32
    return %c0_i32, %c0_i32_0 : i32, i32
  }
  func.func @transform_10(%arg0: i32) -> (i32, i32) {
    %c0_i32 = arith.constant 0 : i32
    %c0_i32_0 = arith.constant 0 : i32
    %c0_i32_1 = arith.constant 0 : i32
    return %c0_i32, %c0_i32_0 : i32, i32
  }
  func.func @transform_11(%arg0: i32) -> (i32, i32) {
    %c0_i32 = arith.constant 0 : i32
    %c0_i32_0 = arith.constant 0 : i32
    return %arg0, %c0_i32 : i32, i32
  }
}

</mosaic_0001>

<bundles_post_ra>
// kernel: tpu_custom_call.1
= control target key start
LH: loop header
LB: loop body
LE: loop exit
PB: predicated region body
PF: predicated region fallthrough
CT: control target
= control target key end

     0   :  { %16 = vsyncpa [#allocation3], 0  ;;  %s3135_s0 = inlined_call_operand.vmem [shape: f32[24,32], index: 0, kind: input, shape index: {}]   ;;  %s3136_s1 = inlined_call_operand.hbm [shape: bf16[24,768], index: 1, kind: input, shape index: {}]   ;;  %s3137_s2 = inlined_call_operand.vmem [shape: f32[24,1], index: 2, kind: input, shape index: {}]   ;;  %s3138_s3 = inlined_call_operand.hbm [shape: f32[32,128], index: 3, kind: input, shape index: {}]   ;;  %s3139_s4 = inlined_call_operand.vmem [shape: f32[1,128], index: 4, kind: input, shape index: {}]   ;;  %s3140_s5 = inlined_call_operand.hbm [shape: f32[128,128], index: 5, kind: input, shape index: {}]   ;;  %s3141_s6 = inlined_call_operand.vmem [shape: f32[1,128], index: 6, kind: input, shape index: {}]   ;;  %s3142_s7 = inlined_call_operand.hbm [shape: bf16[768,384], index: 7, kind: input, shape index: {}]   ;;  %s3143_s8 = inlined_call_operand.vmem [shape: f32[1,384], index: 8, kind: input, shape index: {}]   ;;  %s3144_s9 = inlined_call_operand.hbm [shape: f32[384,128], index: 9, kind: input, shape index: {}]   ;;  %s3145_s10 = inlined_call_operand.vmem [shape: f32[1,128], index: 10, kind: input, shape index: {}]   ;;  %s3146_s11 = inlined_call_operand.hbm [shape: f32[24,128], index: 11, kind: output, shape index: {}]  }
   0x1   :  { %17 = vsyncpa [#allocation6], 0 }
   0x2   :  { %18 = vsyncpa [#allocation9], 0 }
   0x3   :  { %19 = vsyncpa [#allocation4], 0  ;;  %s2837_s17 = smov [#allocation5]  }
   0x4   :  { %s41_s18 = sshll.u32 %s2837_s17, 4  ;;  %s42_s18 = int_to_ptr.vmem [resolvable:$true] %s41_s18 }
   0x5   :  { %s2717_s19 = scalar_lea.vmem %s42_s18, 512  ;;  %p2722_p1 = scmp.lt.s32.totalorder %s42_s18, %s42_s18 }
   0x6   :  { %p2718_p0 = scmp.ne.s32.totalorder %s42_s18, %s2717_s19  ;;  %p2723_p2 = scmp.lt.s32.totalorder %s2717_s19, %s2717_s19 }
   0x8   :  { %p2724_p3 = por %p2723_p2, %p2722_p1 }
   0xa   :  { %p2725_p4 = pnand %p2724_p3, %p2718_p0 }
   0xc   :  { %2728 = shalt.err (!%p2725_p4)
}
   0xd   :  { %s2838_s20 = smov 128   ;;  %s2839_s21 = smov 8  }
   0xe   :  { %47 = dma.hbm_to_vmem [thread:$0]  %s3138_s3, 512, %s42_s18, [#allocation6], %s2838_s20, %s2838_s20, %s2839_s21  }
   0xf   :  { %s2840_s24 = smov [#allocation8]  }
  0x10   :  { %s69_s25 = sshll.u32 %s2840_s24, 4  ;;  %s70_s25 = int_to_ptr.vmem [resolvable:$true] %s69_s25 }
  0x11   :  { %s2737_s26 = scalar_lea.vmem %s70_s25, 18432  ;;  %p2742_p6 = scmp.lt.s32.totalorder %s70_s25, %s70_s25 }
  0x12   :  { %p2738_p5 = scmp.ne.s32.totalorder %s70_s25, %s2737_s26  ;;  %p2743_p7 = scmp.lt.s32.totalorder %s2737_s26, %s2737_s26 }
  0x14   :  { %p2744_p8 = por %p2743_p7, %p2742_p6 }
  0x16   :  { %p2745_p9 = pnand %p2744_p8, %p2738_p5 }
  0x18   :  { %2748 = shalt.err (!%p2745_p9)
}
  0x19   :  { %s2841_s27 = smov 192   ;;  %s2842_s28 = smov 12  }
  0x1a   :  { %75 = dma.hbm_to_vmem [thread:$0]  %s3142_s7, 18432, %s70_s25, [#allocation9], %s2841_s27, %s2841_s27, %s2842_s28  }
  0x1b   :  { %s2843_s12 = smov [#allocation2]  }
  0x1c   :  { %s27_s13 = sshll.u32 %s2843_s12, 4  ;;  %s28_s13 = int_to_ptr.vmem [resolvable:$true] %s27_s13 }
  0x1d   :  { %s2757_s3 = scalar_lea.vmem %s28_s13, 1152  ;;  %p2762_p11 = scmp.lt.s32.totalorder %s28_s13, %s28_s13 }
  0x1e   :  { %p2758_p10 = scmp.ne.s32.totalorder %s28_s13, %s2757_s3  ;;  %p2763_p12 = scmp.lt.s32.totalorder %s2757_s3, %s2757_s3 }
  0x20   :  { %p2764_p13 = por %p2763_p12, %p2762_p11 }
  0x22   :  { %p2765_p0 = pnand %p2764_p13, %p2758_p10 }
  0x24   :  { %2768 = shalt.err (!%p2765_p0)
}
  0x25   :  { %s2844_s14 = smov 384   ;;  %s2845_s15 = smov 24  }
  0x26   :  { %33 = dma.hbm_to_vmem [thread:$0]  %s3136_s1, 1152, %s28_s13, [#allocation3], %s2844_s14, %s2844_s14, %s2845_s15  }
  0x27   :  { %s2846_s18 = smov [#allocation7]   ;;  %s2847_s7 = smov [#allocation10]  }
  0x28   :  { %s55_s19 = sshll.u32 %s2846_s18, 4  ;;  %s83_s22 = sshll.u32 %s2847_s7, 4  ;;  %s56_s19 = int_to_ptr.vmem [resolvable:$true] %s55_s19  ;;  %s84_s22 = int_to_ptr.vmem [resolvable:$true] %s83_s22 }
  0x29   :  { %s2777_s23 = scalar_lea.vmem %s56_s19, 2048  ;;  %p2782_p2 = scmp.lt.s32.totalorder %s56_s19, %s56_s19 }
  0x2a   :  { %p2778_p1 = scmp.ne.s32.totalorder %s56_s19, %s2777_s23  ;;  %p2783_p3 = scmp.lt.s32.totalorder %s2777_s23, %s2777_s23 }
  0x2c   :  { %p2784_p4 = por %p2783_p3, %p2782_p2 }
  0x2e   :  { %p2785_p5 = pnand %p2784_p4, %p2778_p1 }
  0x30   :  { %2788 = shalt.err (!%p2785_p5)
}
  0x31   :  { %61 = dma.hbm_to_vmem [thread:$0]  %s3140_s5, 2048, %s56_s19, [#allocation6], %s2838_s20, %s2838_s20, %s2839_s21  }
  0x32   :  { %s2797_s1 = scalar_lea.vmem %s84_s22, 6144  ;;  %p2802_p7 = scmp.lt.s32.totalorder %s84_s22, %s84_s22 }
  0x33   :  { %p2798_p6 = scmp.ne.s32.totalorder %s84_s22, %s2797_s1  ;;  %p2803_p8 = scmp.lt.s32.totalorder %s2797_s1, %s2797_s1 }
  0x35   :  { %p2804_p9 = por %p2803_p8, %p2802_p7 }
  0x37   :  { %p2805_p10 = pnand %p2804_p9, %p2798_p6 }
  0x39   :  { %2808 = shalt.err (!%p2805_p10)
}
  0x3a   :  { %89 = dma.hbm_to_vmem [thread:$0]  %s3144_s9, 6144, %s84_s22, [#allocation9], %s2838_s20, %s2838_s20, %s2839_s21  }
  0x3b   :  { %2829 = dma.done.wait [#allocation3], 1152  }
  0x3c   :  { %2830 = vsyncadd [#allocation3], 4294966144 }
  0x3d   :  { %2831 = dma.done.wait [#allocation6], 2560  }
  0x3e   :  { %2832 = vsyncadd [#allocation6], 4294964736 }
  0x3f   :  { %2833 = dma.done.wait [#allocation9], 24576  }
  0x40   :  { %2834 = vsyncadd [#allocation9], 4294942720  ;;  %v2848_v0 = vmov 0.0   ;;  %vm2849_vm0 = vmmov 0   ;;  %v114_v1 = vld [vmem:[#allocation5 + $0x18] sm:$0xff]  ;;  %v113_v2 = vld [vmem:[#allocation5 + $0x10] sm:$0xff] }
  0x41   :  { %2350 = vmatprep.subr.mxu0 %v2848_v0  ;;  %2358 = vmatprep.mubr.msk.f32.mxu0 %vm2849_vm0, %v2848_v0  ;;  %v112_v3 = vld [vmem:[#allocation5 + $0x8] sm:$0xff]  ;;  %v111_v4 = vld [vmem:[#allocation5] sm:$0xff]  ;;  %v108_v5 = vld [vmem:[%s3135_s0] sm:$0xff]  ;;  %vm122_vm1 = vcmask 261120  }
  0x42   :  { %2367 = vmatprep.subr.mxu1 %v2848_v0  ;;  %2399 = vmatprep.mubr.msk.f32.mxu1 %vm2849_vm0, %v2848_v0  ;;  %v2468_v6 = vld [vmem:[#allocation8 + $0xac] ss:$12 sps:$4 sm:$0xff]   ;;  %v2466_v7 = vld [vmem:[#allocation8 + $0xa8] ss:$12 sps:$4 sm:$0xff]   ;;  %v109_v9 = vld [vmem:[%s3135_s0 + $0x8] sm:$0xff] }
  0x43   :  { %2351 = vmatpush3.msra.mxu0 %v114_v1  ;;  %v2471_v8 = vld [vmem:[#allocation8 + $0x94] ss:$12 sps:$4 sm:$0xff]   ;;  %v2469_v10 = vld [vmem:[#allocation8 + $0x90] ss:$12 sps:$4 sm:$0xff]   ;;  %v110_v12 = vld [vmem:[%s3135_s0 + $0x10] sm:$0xff] }
  0x44   :  { %2352 = vmatprep.subr.mxu0 %v2848_v0  ;;  %v2474_v11 = vld [vmem:[#allocation8 + $0x7c] ss:$12 sps:$4 sm:$0xff]   ;;  %v2472_v13 = vld [vmem:[#allocation8 + $0x78] ss:$12 sps:$4 sm:$0xff]   ;;  %v241_v16 = vld [vmem:[#allocation7 + $0x70] sm:$0xff] }
  0x45   :  { %2353 = vmatpush3.msra.mxu0 %v113_v2  ;;  %v242_v14 = vld [vmem:[#allocation7 + $0x78] sm:$0xff]  ;;  %v2477_v15 = vld [vmem:[#allocation8 + $0x64] ss:$12 sps:$4 sm:$0xff]   ;;  %v240_v17 = vld [vmem:[#allocation7 + $0x68] sm:$0xff] }
  0x46   :  { %2354 = vmatprep.subr.mxu0 %v2848_v0  ;;  %2368 = vmatpush3.msra.mxu1 %v242_v14  ;;  %v2475_v18 = vld [vmem:[#allocation8 + $0x60] ss:$12 sps:$4 sm:$0xff]   ;;  %v238_v21 = vld [vmem:[#allocation7 + $0x58] sm:$0xff]  ;;  %v2478_v22 = vld [vmem:[#allocation8 + $0x48] ss:$12 sps:$4 sm:$0xff]  }
  0x47   :  { %2355 = vmatpush3.msra.mxu0 %v112_v3  ;;  %2369 = vmatprep.subr.mxu1 %v2848_v0  ;;  %v239_v19 = vld [vmem:[#allocation7 + $0x60] sm:$0xff]  ;;  %v2480_v20 = vld [vmem:[#allocation8 + $0x4c] ss:$12 sps:$4 sm:$0xff]   ;;  %v2481_v24 = vld [vmem:[#allocation8 + $0x30] ss:$12 sps:$4 sm:$0xff]  }
  0x48   :  { %2356 = vmatprep.subr.mxu0 %v2848_v0  ;;  %2370 = vmatpush3.msra.mxu1 %v241_v16  ;;  %v2483_v23 = vld [vmem:[#allocation8 + $0x34] ss:$12 sps:$4 sm:$0xff]   ;;  %v2486_v25 = vld [vmem:[#allocation8 + $0x1c] ss:$12 sps:$4 sm:$0xff]   ;;  %v2484_v26 = vld [vmem:[#allocation8 + $0x18] ss:$12 sps:$4 sm:$0xff]  }
  0x49   :  { %2357 = vmatpush3.msra.mxu0 %v111_v4  ;;  %2371 = vmatprep.subr.mxu1 %v2848_v0  ;;  %v2489_v27 = vld [vmem:[#allocation8 + $0x4] ss:$12 sps:$4 sm:$0xff]   ;;  %v2487_v28 = vld [vmem:[#allocation8] ss:$12 sps:$4 sm:$0xff]   ;;  %v2490_v30 = vld [vmem:[#allocation8 + $0x168] ss:$12 sps:$4 sm:$0xff]  }
  0x4a   :  { %2359 = vmatmul.mubr.msk.f32.vlgmr.msra.gmra.mxu0 %vm122_vm1, %v108_v5  ;;  %1385 = vmatprep.subr.bf16.mxu0 %v2468_v6  ;;  %v2492_v29 = vld [vmem:[#allocation8 + $0x16c] ss:$12 sps:$4 sm:$0xff]   ;;  %v2495_v31 = vld [vmem:[#allocation8 + $0x154] ss:$12 sps:$4 sm:$0xff]   ;;  %v2493_v32 = vld [vmem:[#allocation8 + $0x150] ss:$12 sps:$4 sm:$0xff]  }
  0x4b   :  { %2361 = vmatprep.mubr.msk.f32.mxu0 %vm2849_vm0, %v2848_v0  ;;  %1386 = vmatpush1.bf16.msra.mxu0 %v2466_v7  ;;  %v2498_v33 = vld [vmem:[#allocation8 + $0x13c] ss:$12 sps:$4 sm:$0xff]   ;;  %v2496_v34 = vld [vmem:[#allocation8 + $0x138] ss:$12 sps:$4 sm:$0xff]   ;;  %v237_v35 = vld [vmem:[#allocation7 + $0x50] sm:$0xff] }
  0x4c   :  { %1387 = vmatprep.subr.bf16.mxu0 %v2471_v8  ;;  %2372 = vmatpush3.msra.mxu1 %v240_v17  ;;  %v236_v36 = vld [vmem:[#allocation7 + $0x48] sm:$0xff]  ;;  %v2501_v37 = vld [vmem:[#allocation8 + $0x124] ss:$12 sps:$4 sm:$0xff]   ;;  %v234_v40 = vld [vmem:[#allocation7 + $0x38] sm:$0xff] }
  0x4d   :  { %2373 = vmatprep.subr.mxu1 %v2848_v0  ;;  %v2499_v38 = vld [vmem:[#allocation8 + $0x120] ss:$12 sps:$4 sm:$0xff]   ;;  %v2502_v42 = vld [vmem:[#allocation8 + $0x108] ss:$12 sps:$4 sm:$0xff]   ;;  %v2505_v46 = vld [vmem:[#allocation8 + $0xf0] ss:$12 sps:$4 sm:$0xff]  }
  0x4e   :  { %2362 = vmatmul.mubr.msk.f32.gmra.mxu0 %vm122_vm1, %v109_v9  ;;  %2374 = vmatpush3.msra.mxu1 %v239_v19  ;;  %v235_v39 = vld [vmem:[#allocation7 + $0x40] sm:$0xff]  ;;  %v2504_v41 = vld [vmem:[#allocation8 + $0x10c] ss:$12 sps:$4 sm:$0xff]   ;;  %v233_v43 = vld [vmem:[#allocation7 + $0x30] sm:$0xff] }
  0x4f   :  { %2364 = vmatprep.mubr.msk.f32.mxu0 %vm2849_vm0, %v2848_v0  ;;  %1388 = vmatpush1.bf16.msra.mxu0 %v2469_v10  ;;  %v232_v44 = vld [vmem:[#allocation7 + $0x28] sm:$0xff]  ;;  %v2507_v45 = vld [vmem:[#allocation8 + $0xf4] ss:$12 sps:$4 sm:$0xff]   ;;  %v230_v48 = vld [vmem:[#allocation7 + $0x18] sm:$0xff] }
  0x50   :  { %1389 = vmatprep.subr.bf16.mxu0 %v2474_v11  ;;  %2375 = vmatprep.subr.mxu1 %v2848_v0  ;;  %v231_v47 = vld [vmem:[#allocation7 + $0x20] sm:$0xff]  ;;  %v2510_v50 = vld [vmem:[#allocation8 + $0xdc] ss:$12 sps:$4 sm:$0xff]   ;;  %v229_v51 = vld [vmem:[#allocation7 + $0x10] sm:$0xff] }
  0x51   :  { %2376 = vmatpush3.msra.mxu1 %v238_v21  ;;  %v2508_v49 = vld [vmem:[#allocation8 + $0xd8] ss:$12 sps:$4 sm:$0xff]   ;;  %v228_v52 = vld [vmem:[#allocation7 + $0x8] sm:$0xff]  ;;  %v2976_v57 = vld [vmem:[#allocation2 + $0x4] ss:$24 sps:$4 sm:$0xff]  }
  0x52   :  { %2365 = vmatmul.mubr.msk.f32.gmra.mxu0 %vm122_vm1, %v110_v12  ;;  %2377 = vmatprep.subr.mxu1 %v2848_v0  ;;  %v2513_v53 = vld [vmem:[#allocation8 + $0xc4] ss:$12 sps:$4 sm:$0xff]   ;;  %v2511_v54 = vld [vmem:[#allocation8 + $0xc0] ss:$12 sps:$4 sm:$0xff]   ;;  %v2520_v60 = vld [vmem:[#allocation8 + $0x3a8] ss:$12 sps:$4 sm:$0xff]  }
  0x53   :  { %1390 = vmatpush1.bf16.msra.mxu0 %v2472_v13  ;;  %2378 = vmatpush3.msra.mxu1 %v237_v35  ;;  %v227_v55 = vld [vmem:[#allocation7] sm:$0xff]  ;;  %v2516_v56 = vld [vmem:[#allocation8 + $0x22c] ss:$12 sps:$4 sm:$0xff]   ;;  %v2526_v62 = vld [vmem:[#allocation8 + $0x390] ss:$12 sps:$4 sm:$0xff]  }
  0x54   :  { %1391 = vmatprep.subr.bf16.mxu0 %v2477_v15  ;;  %2379 = vmatprep.subr.mxu1 %v2848_v0  ;;  %v2522_v58 = vld [vmem:[#allocation8 + $0x3ac] ss:$12 sps:$4 sm:$0xff]   ;;  %v2528_v61 = vld [vmem:[#allocation8 + $0x394] ss:$12 sps:$4 sm:$0xff]   ;;  %v2534_v63 = vld [vmem:[#allocation8 + $0x37c] ss:$12 sps:$4 sm:$0xff]  }
  0x55   :  { %2380 = vmatpush3.msra.mxu1 %v236_v36  ;;  %v2978_v59 = vld [vmem:[#allocation2] ss:$24 sps:$4 sm:$0xff]   ;;  %1417 = vmatprep.mubr.bf16.mxu0 %v2976_v57  ;;  %v2538_v3 = vld [vmem:[#allocation8 + $0x360] ss:$12 sps:$4 sm:$0xff]   ;;  %v2544_v5 = vld [vmem:[#allocation8 + $0x348] ss:$12 sps:$4 sm:$0xff]  }
  0x56   :  { %2381 = vmatprep.subr.mxu1 %v2848_v0  ;;  %v2532_v1 = vld [vmem:[#allocation8 + $0x378] ss:$12 sps:$4 sm:$0xff]   ;;  %v2552_v6 = vld [vmem:[#allocation8 + $0x334] ss:$12 sps:$4 sm:$0xff]   ;;  %v2550_v7 = vld [vmem:[#allocation8 + $0x330] ss:$12 sps:$4 sm:$0xff]  }
  0x57   :  { %1392 = vmatpush1.bf16.msra.mxu0 %v2475_v18  ;;  %2382 = vmatpush3.msra.mxu1 %v235_v39  ;;  %v2540_v2 = vld [vmem:[#allocation8 + $0x364] ss:$12 sps:$4 sm:$0xff]   ;;  %v2546_v4 = vld [vmem:[#allocation8 + $0x34c] ss:$12 sps:$4 sm:$0xff]   ;;  %v2558_v8 = vld [vmem:[#allocation8 + $0x31c] ss:$12 sps:$4 sm:$0xff]  }
  0x58   :  { %1393 = vmatprep.subr.bf16.mxu0 %v2480_v20  ;;  %2383 = vmatprep.subr.mxu1 %v2848_v0  ;;  %v2556_v9 = vld [vmem:[#allocation8 + $0x318] ss:$12 sps:$4 sm:$0xff]   ;;  %v2562_v11 = vld [vmem:[#allocation8 + $0x300] ss:$12 sps:$4 sm:$0xff]   ;;  %v2568_v13 = vld [vmem:[#allocation8 + $0x468] ss:$12 sps:$4 sm:$0xff]  }
  0x59   :  { %2384 = vmatpush3.msra.mxu1 %v234_v40  ;;  %v2564_v10 = vld [vmem:[#allocation8 + $0x304] ss:$12 sps:$4 sm:$0xff]   ;;  %v2570_v12 = vld [vmem:[#allocation8 + $0x46c] ss:$12 sps:$4 sm:$0xff]   ;;  %v2576_v14 = vld [vmem:[#allocation8 + $0x454] ss:$12 sps:$4 sm:$0xff]  }
  0x5a   :  { %2385 = vmatprep.subr.mxu1 %v2848_v0  ;;  %v2574_v15 = vld [vmem:[#allocation8 + $0x450] ss:$12 sps:$4 sm:$0xff]   ;;  %v2580_v17 = vld [vmem:[#allocation8 + $0x438] ss:$12 sps:$4 sm:$0xff]   ;;  %v2586_v19 = vld [vmem:[#allocation8 + $0x420] ss:$12 sps:$4 sm:$0xff]  }
  0x5b   :  { %1394 = vmatpush1.bf16.msra.mxu0 %v2478_v22  ;;  %2386 = vmatpush3.msra.mxu1 %v233_v43  ;;  %v2582_v16 = vld [vmem:[#allocation8 + $0x43c] ss:$12 sps:$4 sm:$0xff]   ;;  %v2588_v18 = vld [vmem:[#allocation8 + $0x424] ss:$12 sps:$4 sm:$0xff]   ;;  %v2594_v20 = vld [vmem:[#allocation8 + $0x40c] ss:$12 sps:$4 sm:$0xff]  }
  0x5c   :  { %1395 = vmatprep.subr.bf16.mxu0 %v2483_v23  ;;  %2387 = vmatprep.subr.mxu1 %v2848_v0  ;;  %v2592_v21 = vld [vmem:[#allocation8 + $0x408] ss:$12 sps:$4 sm:$0xff]   ;;  %v2598_v23 = vld [vmem:[#allocation8 + $0x3f0] ss:$12 sps:$4 sm:$0xff]   ;;  %v2646_v39 = vld [vmem:[#allocation8 + $0x398] ss:$12 sps:$4 sm:$0xff]  }
  0x5d   :  { %2388 = vmatpush3.msra.mxu1 %v232_v44  ;;  %v2600_v22 = vld [vmem:[#allocation8 + $0x3f4] ss:$12 sps:$4 sm:$0xff]   ;;  %v2640_v36 = vld [vmem:[#allocation8 + $0x470] ss:$12 sps:$4 sm:$0xff]   ;;  %v2006_v44 = vld [vmem:[%s3139_s4] ss:$0 sm:$0xff] }
  0x5e   :  { %2389 = vmatprep.subr.mxu1 %v2848_v0  ;;  %v2648_v40 = vld [vmem:[#allocation8 + $0x440] ss:$12 sps:$4 sm:$0xff]   ;;  %v2654_v43 = vld [vmem:[#allocation8 + $0x368] ss:$12 sps:$4 sm:$0xff]  }
  0x5f   :  { %1396 = vmatpush1.bf16.msra.mxu0 %v2481_v24  ;;  %2390 = vmatpush3.msra.mxu1 %v231_v47  ;;  %v354_v24 = vld [vmem:[#allocation2 + $0x30] sm:$0xff] }
  0x60   :  { %1397 = vmatprep.subr.bf16.mxu0 %v2486_v25  ;;  %2391 = vmatprep.subr.mxu1 %v2848_v0  ;;  %v2982_v25 = vcombine.high %v354_v24, %v354_v24 }
  0x61   :  { %2392 = vmatpush3.msra.mxu1 %v230_v48  ;;  %v2658_v48 = vld [vmem:[#allocation8 + $0x350] ss:$12 sps:$4 sm:$0xff]  }
  0x62   :  { %2393 = vmatprep.subr.mxu1 %v2848_v0 }
  0x63   :  { %1398 = vmatpush1.bf16.msra.mxu0 %v2484_v26  ;;  %2394 = vmatpush3.msra.mxu1 %v229_v51  ;;  %v2984_v26 = vcombine.low %v354_v24, %v354_v24  ;;  %v2547_v24 = vld [vmem:[#allocation8 + $0x1b0] ss:$12 sps:$4 sm:$0xff]  }
  0x64   :  { %1399 = vmatprep.subr.bf16.mxu0 %v2489_v27  ;;  %2395 = vmatprep.subr.mxu1 %v2848_v0  ;;  %v2608_v27 = vld [vmem:[#allocation8 + $0x3dc] ss:$12 sps:$4 sm:$0xff]  }
  0x65   :  { %2396 = vmatpush3.msra.mxu1 %v228_v52  ;;  %v2660_v52 = vld [vmem:[#allocation8 + $0x3f8] ss:$12 sps:$4 sm:$0xff]  }
  0x66   :  { %2397 = vmatprep.subr.mxu1 %v2848_v0 }
  0x67   :  { %1400 = vmatpush1.bf16.msra.mxu0 %v2487_v28  ;;  %2398 = vmatpush3.msra.mxu1 %v227_v55  ;;  %v2606_v28 = vld [vmem:[#allocation8 + $0x3d8] ss:$12 sps:$4 sm:$0xff]  }
  0x68   :  { %1401 = vmatprep.subr.bf16.mxu0 %v2492_v29  ;;  %1436 = vmatprep.subr.bf16.mxu1 %v2516_v56  ;;  %v2614_v29 = vld [vmem:[#allocation8 + $0x3c4] ss:$12 sps:$4 sm:$0xff]  }
  0x6b   :  { %1402 = vmatpush2.bf16.msra.mxu0 %v2490_v30  ;;  %v2612_v30 = vld [vmem:[#allocation8 + $0x3c0] ss:$12 sps:$4 sm:$0xff]  }
  0x6c   :  { %1403 = vmatprep.subr.bf16.mxu0 %v2495_v31  ;;  %v2621_v31 = vld [vmem:[#allocation2 + $0x14] ss:$24 sps:$4 sm:$0xff]  }
  0x6f   :  { %1404 = vmatpush2.bf16.msra.mxu0 %v2493_v32  ;;  %v2619_v32 = vld [vmem:[#allocation2 + $0x10] ss:$24 sps:$4 sm:$0xff]  }
  0x70   :  { %1405 = vmatprep.subr.bf16.mxu0 %v2498_v33  ;;  %v356_v33 = vld [vmem:[#allocation2 + $0x40] sm:$0xff] }
  0x71   :  { %v2988_v35 = vcombine.low %v356_v33, %v356_v33 }
  0x73   :  { %1406 = vmatpush2.bf16.msra.mxu0 %v2496_v34  ;;  %v2025_v34 = vcombine.high %v356_v33, %v356_v33  ;;  %v2573_v33 = vld [vmem:[#allocation8 + $0x2d4] ss:$12 sps:$4 sm:$0xff]  }
  0x74   :  { %1407 = vmatprep.subr.bf16.mxu0 %v2501_v37  ;;  %v2642_v37 = vld [vmem:[#allocation8 + $0x3b0] ss:$12 sps:$4 sm:$0xff]  }
  0x77   :  { %1408 = vmatpush2.bf16.msra.mxu0 %v2499_v38  ;;  %v2644_v38 = vld [vmem:[#allocation8 + $0x458] ss:$12 sps:$4 sm:$0xff]  }
  0x78   :  { %1409 = vmatprep.subr.bf16.mxu0 %v2504_v41  ;;  %v2650_v41 = vld [vmem:[#allocation8 + $0x380] ss:$12 sps:$4 sm:$0xff]  }
  0x7b   :  { %1410 = vmatpush2.bf16.msra.mxu0 %v2502_v42  ;;  %v2652_v42 = vld [vmem:[#allocation8 + $0x428] ss:$12 sps:$4 sm:$0xff]  }
  0x7c   :  { %1411 = vmatprep.subr.bf16.mxu0 %v2507_v45 }
  0x7f   :  { %1412 = vmatpush2.bf16.msra.mxu0 %v2505_v46  ;;  %v2656_v46 = vld [vmem:[#allocation8 + $0x410] ss:$12 sps:$4 sm:$0xff]  }
  0x80   :  { %1413 = vmatprep.subr.bf16.mxu0 %v2510_v50 }
  0x83   :  { %1414 = vmatpush2.bf16.msra.mxu0 %v2508_v49 }
  0x84   :  { %1415 = vmatprep.subr.bf16.mxu0 %v2513_v53 }
  0x87   :  { %1416 = vmatpush2.bf16.msra.mxu0 %v2511_v54  ;;  %v2662_v54 = vld [vmem:[#allocation8 + $0x338] ss:$12 sps:$4 sm:$0xff]  }
  0x88   :  { %1487 = vmatprep.subr.bf16.mxu0 %v2522_v58 }
  0x8a   :  { %1418 = vmatmul.mubr.bf16.vlgmr.msra.gmra.mxu0 %v2978_v59 }
  0x8b   :  { %1488 = vmatpush1.bf16.msra.mxu0 %v2520_v60  ;;  %1427 = vmatprep.mubr.bf16.mxu0 %v2982_v25  ;;  %v2664_v60 = vld [vmem:[#allocation8 + $0x3e0] ss:$12 sps:$4 sm:$0xff]  }
  0x8c   :  { %1489 = vmatprep.subr.bf16.mxu0 %v2528_v61 }
  0x8f   :  { %1490 = vmatpush1.bf16.msra.mxu0 %v2526_v62  ;;  %v2666_v62 = vld [vmem:[#allocation8 + $0x320] ss:$12 sps:$4 sm:$0xff]  }
  0x90   :  { %1491 = vmatprep.subr.bf16.mxu0 %v2534_v63 }
  0x92   :  { %1428 = vmatmul.mubr.bf16.gmra.mxu0 %v2984_v26 }
  0x93   :  { %1492 = vmatpush1.bf16.msra.mxu0 %v2532_v1  ;;  %1519 = vmatprep.mubr.bf16.mxu0 %v2621_v31 }
  0x94   :  { %1493 = vmatprep.subr.bf16.mxu0 %v2540_v2  ;;  %v2668_v2 = vld [vmem:[#allocation8 + $0x3c8] ss:$12 sps:$4 sm:$0xff]  }
  0x97   :  { %1494 = vmatpush1.bf16.msra.mxu0 %v2538_v3  ;;  %v2670_v3 = vld [vmem:[#allocation8 + $0x308] ss:$12 sps:$4 sm:$0xff]  }
  0x98   :  { %1495 = vmatprep.subr.bf16.mxu0 %v2546_v4 }
  0x9b   :  { %1496 = vmatpush1.bf16.msra.mxu0 %v2544_v5  ;;  %v2514_v5 = vld [vmem:[#allocation8 + $0x228] ss:$12 sps:$4 sm:$0xff]  }
  0x9c   :  { %1497 = vmatprep.subr.bf16.mxu0 %v2552_v6 }
  0x9f   :  { %1498 = vmatpush1.bf16.msra.mxu0 %v2550_v7  ;;  %v2525_v7 = vld [vmem:[#allocation8 + $0x214] ss:$12 sps:$4 sm:$0xff]  }
  0xa0   :  { %1499 = vmatprep.subr.bf16.mxu0 %v2558_v8 }
  0xa3   :  { %1500 = vmatpush1.bf16.msra.mxu0 %v2556_v9 }
  0xa4   :  { %1501 = vmatprep.subr.bf16.mxu0 %v2564_v10  ;;  %v2523_v10 = vld [vmem:[#allocation8 + $0x210] ss:$12 sps:$4 sm:$0xff]  }
  0xa7   :  { %1502 = vmatpush1.bf16.msra.mxu0 %v2562_v11 }
  0xa8   :  { %1503 = vmatprep.subr.bf16.mxu0 %v2570_v12  ;;  %v2531_v12 = vld [vmem:[#allocation8 + $0x1fc] ss:$12 sps:$4 sm:$0xff]  }
  0xab   :  { %1504 = vmatpush2.bf16.msra.mxu0 %v2568_v13 }
  0xac   :  { %1505 = vmatprep.subr.bf16.mxu0 %v2576_v14 }
  0xaf   :  { %1506 = vmatpush2.bf16.msra.mxu0 %v2574_v15  ;;  %v2529_v15 = vld [vmem:[#allocation8 + $0x1f8] ss:$12 sps:$4 sm:$0xff]  }
  0xb0   :  { %1507 = vmatprep.subr.bf16.mxu0 %v2582_v16 }
  0xb3   :  { %1508 = vmatpush2.bf16.msra.mxu0 %v2580_v17  ;;  %v3000_v17 = vld [vmem:[#allocation2 + $0xc] ss:$24 sps:$4 sm:$0xff]  }
  0xb4   :  { %1509 = vmatprep.subr.bf16.mxu0 %v2588_v18  ;;  %v2537_v18 = vld [vmem:[#allocation8 + $0x1e4] ss:$12 sps:$4 sm:$0xff]  }
  0xb7   :  { %1510 = vmatpush2.bf16.msra.mxu0 %v2586_v19 }
  0xb8   :  { %1511 = vmatprep.subr.bf16.mxu0 %v2594_v20  ;;  %v2535_v20 = vld [vmem:[#allocation8 + $0x1e0] ss:$12 sps:$4 sm:$0xff]  }
  0xbb   :  { %1512 = vmatpush2.bf16.msra.mxu0 %v2592_v21  ;;  %v2543_v21 = vld [vmem:[#allocation8 + $0x1cc] ss:$12 sps:$4 sm:$0xff]  }
  0xbc   :  { %1513 = vmatprep.subr.bf16.mxu0 %v2600_v22  ;;  %v2541_v22 = vld [vmem:[#allocation8 + $0x1c8] ss:$12 sps:$4 sm:$0xff]  }
  0xbf   :  { %1514 = vmatpush2.bf16.msra.mxu0 %v2598_v23  ;;  %v2549_v23 = vld [vmem:[#allocation8 + $0x1b4] ss:$12 sps:$4 sm:$0xff]  }
  0xc0   :  { %1515 = vmatprep.subr.bf16.mxu0 %v2608_v27  ;;  %v2555_v27 = vld [vmem:[#allocation8 + $0x19c] ss:$12 sps:$4 sm:$0xff]  }
  0xc3   :  { %1516 = vmatpush2.bf16.msra.mxu0 %v2606_v28  ;;  %v2553_v28 = vld [vmem:[#allocation8 + $0x198] ss:$12 sps:$4 sm:$0xff]  }
  0xc4   :  { %1517 = vmatprep.subr.bf16.mxu0 %v2614_v29  ;;  %v2561_v29 = vld [vmem:[#allocation8 + $0x184] ss:$12 sps:$4 sm:$0xff]  }
  0xc7   :  { %1518 = vmatpush2.bf16.msra.mxu0 %v2612_v30  ;;  %v2559_v30 = vld [vmem:[#allocation8 + $0x180] ss:$12 sps:$4 sm:$0xff]  }
  0xc8   :  { %2262 = vmatprep.subr.bf16.mxu0 %v2640_v36  ;;  %v2577_v36 = vld [vmem:[#allocation8 + $0x2b8] ss:$12 sps:$4 sm:$0xff]  }
  0xca   :  { %1520 = vmatmul.mubr.bf16.vlgmr.msra.gmra.mxu0 %v2619_v32 }
  0xcb   :  { %1529 = vmatprep.mubr.bf16.mxu0 %v2025_v34  ;;  %2263 = vmatpush3.bf16.msra.mxu0 %v2642_v37  ;;  %v2585_v37 = vld [vmem:[#allocation8 + $0x2a4] ss:$12 sps:$4 sm:$0xff]  }
  0xcc   :  { %2264 = vmatprep.subr.bf16.mxu0 %v2644_v38  ;;  %v2583_v38 = vld [vmem:[#allocation8 + $0x2a0] ss:$12 sps:$4 sm:$0xff]  }
  0xcf   :  { %2265 = vmatpush3.bf16.msra.mxu0 %v2646_v39  ;;  %v2591_v39 = vld [vmem:[#allocation8 + $0x28c] ss:$12 sps:$4 sm:$0xff]  }
  0xd0   :  { %2266 = vmatprep.subr.bf16.mxu0 %v2648_v40  ;;  %v2589_v40 = vld [vmem:[#allocation8 + $0x288] ss:$12 sps:$4 sm:$0xff]  }
  0xd2   :  { %1530 = vmatmul.mubr.bf16.gmra.mxu0 %v2988_v35 }
  0xd3   :  { %1666 = vmatprep.mubr.bf16.mxu0 %v2621_v31  ;;  %2267 = vmatpush3.bf16.msra.mxu0 %v2650_v41  ;;  %v2567_v31 = vld [vmem:[#allocation8 + $0x2ec] ss:$12 sps:$4 sm:$0xff]   ;;  %v2597_v41 = vld [vmem:[#allocation8 + $0x274] ss:$12 sps:$4 sm:$0xff]  }
  0xd4   :  { %2268 = vmatprep.subr.bf16.mxu0 %v2652_v42  ;;  %v2595_v42 = vld [vmem:[#allocation8 + $0x270] ss:$12 sps:$4 sm:$0xff]  }
  0xd7   :  { %2269 = vmatpush3.bf16.msra.mxu0 %v2654_v43  ;;  %v2603_v43 = vld [vmem:[#allocation8 + $0x25c] ss:$12 sps:$4 sm:$0xff]  }
  0xd8   :  { %2270 = vmatprep.subr.bf16.mxu0 %v2656_v46  ;;  %v2609_v46 = vld [vmem:[#allocation8 + $0x240] ss:$12 sps:$4 sm:$0xff]  }
  0xdb   :  { %2271 = vmatpush3.bf16.msra.mxu0 %v2658_v48  ;;  %v355_v48 = vld [vmem:[#allocation2 + $0x38] sm:$0xff] }
  0xdc   :  { %2272 = vmatprep.subr.bf16.mxu0 %v2660_v52  ;;  %v2623_v52 = vld [vmem:[#allocation8 + $0x158] ss:$12 sps:$4 sm:$0xff]  }
  0xdf   :  { %2273 = vmatpush3.bf16.msra.mxu0 %v2662_v54  ;;  %v2627_v54 = vld [vmem:[#allocation8 + $0x140] ss:$12 sps:$4 sm:$0xff]  }
  0xe0   :  { %2274 = vmatprep.subr.bf16.mxu0 %v2664_v60  ;;  %v2632_v60 = vld [vmem:[#allocation8 + $0x68] ss:$12 sps:$4 sm:$0xff]  }
  0xe3   :  { %2275 = vmatpush3.bf16.msra.mxu0 %v2666_v62  ;;  %v2634_v62 = vld [vmem:[#allocation8 + $0x50] ss:$12 sps:$4 sm:$0xff]  }
  0xe4   :  { %2276 = vmatprep.subr.bf16.mxu0 %v2668_v2  ;;  %v2637_v2 = vld [vmem:[#allocation8 + $0xe0] ss:$12 sps:$4 sm:$0xff]  }
  0xe7   :  { %2277 = vmatpush3.bf16.msra.mxu0 %v2670_v3  ;;  %v2638_v3 = vld [vmem:[#allocation8 + $0x20] ss:$12 sps:$4 sm:$0xff]  }
  0xe8   :  { %2408 = vmatprep.subr.mxu0 %v2848_v0 }
  0xea   :  { %1667 = vmatmul.mubr.bf16.vlgmr.msra.gmra.mxu0 %v2619_v32  ;;  %v2565_v32 = vld [vmem:[#allocation8 + $0x2e8] ss:$12 sps:$4 sm:$0xff]  }
  0xeb   :  { %1674 = vmatprep.mubr.bf16.mxu0 %v2025_v34  ;;  %v2571_v34 = vld [vmem:[#allocation8 + $0x2d0] ss:$12 sps:$4 sm:$0xff]  }
  0xf2   :  { %1675 = vmatmul.mubr.bf16.gmra.mxu0 %v2988_v35  ;;  %v2579_v35 = vld [vmem:[#allocation8 + $0x2bc] ss:$12 sps:$4 sm:$0xff]  }
  0xf3   :  { %2440 = vmatprep.mubr.msk.f32.mxu0 %vm2849_vm0, %v2848_v0 }
 0x10a   :  { %v198_v45 = vpop.f32.mrf.mxu0 }
 0x10b   :  { %v199_v47 = vadd.f32 %v2006_v44, %v198_v45  ;;  %v2611_v45 = vld [vmem:[#allocation8 + $0x244] ss:$12 sps:$4 sm:$0xff]  }
 0x10c   :  { %v2360_v49 = vpop.f32.mrf.mxu0 }
 0x10d   :  { %v215_v50 = vmul.f32 1.442695, %v199_v47  ;;  %vm212_vm2 = vcmp.gt.f32.partialorder %v199_v47, 0.0  ;;  %v3005_v49 = vld [vmem:[#allocation2 + $0x8] ss:$24 sps:$4 sm:$0xff]  }
 0x10e   :  { %v203_v51 = vpop.f32.mrf.mxu0 }
 0x10f   :  { %2673 = vpow2.f32 %v215_v50  ;;  %v204_v53 = vadd.f32 %v2006_v44, %v203_v51  ;;  %v2622_v50 = vld [vmem:[#allocation8 + $0xb0] ss:$12 sps:$4 sm:$0xff]   ;;  %v3007_v51 = vcombine.high %v355_v48, %v355_v48 }
 0x110   :  { %v2363_v55 = vpop.f32.mrf.mxu0 }
 0x111   :  { %v217_v56 = vmul.f32 1.442695, %v204_v53  ;;  %vm213_vm3 = vcmp.gt.f32.partialorder %v204_v53, 0.0  ;;  %v3011_v55 = vcombine.low %v355_v48, %v355_v48  ;;  %v1735_v48 = vld [vmem:[#allocation10 + $0x40] sm:$0xff] }
 0x112   :  { %v208_v58 = vpop.f32.mrf.mxu0 }
 0x113   :  { %2675 = vpow2.f32 %v217_v56  ;;  %v209_v61 = vadd.f32 %v2006_v44, %v208_v58  ;;  %v2601_v44 = vld [vmem:[#allocation8 + $0x258] ss:$12 sps:$4 sm:$0xff]   ;;  %v2629_v56 = vld [vmem:[#allocation8 + $0x80] ss:$12 sps:$4 sm:$0xff]   ;;  %v2631_v58 = vld [vmem:[#allocation8 + $0x128] ss:$12 sps:$4 sm:$0xff]  }
 0x114   :  { %v2366_v63 = vpop.f32.mrf.mxu0 }
 0x115   :  { %v219_v1 = vmul.f32 1.442695, %v209_v61  ;;  %vm214_vm4 = vcmp.gt.f32.partialorder %v209_v61, 0.0  ;;  %v2635_v63 = vld [vmem:[#allocation8 + $0xf8] ss:$12 sps:$4 sm:$0xff]  }
 0x117   :  { %2677 = vpow2.f32 %v219_v1  ;;  %v2636_v1 = vld [vmem:[#allocation8 + $0x38] ss:$12 sps:$4 sm:$0xff]  }
 0x11c   :  { %v2674_v4 = vpop.eup %2673 }
 0x11d   :  { %v2010_v6 = vadd.f32 -1.0, %v2674_v4  ;;  %v2639_v4 = vld [vmem:[#allocation8 + $0xc8] ss:$12 sps:$4 sm:$0xff]  }
 0x11f   :  { %v224_v8 = vsel %vm212_vm2, %v199_v47, %v2010_v6  ;;  %v2618_v47 = vld [vmem:[#allocation8 + $0x170] ss:$12 sps:$4 sm:$0xff]  }
 0x120   :  { %v2676_v9 = vpop.eup %2675  ;;  %2400 = vmatmul.mubr.f32.vlgmr.msra.gmra.mxu1 %v224_v8  ;;  %v2643_v6 = vld [vmem:[#allocation8 + $0x2f0] ss:$12 sps:$4 sm:$0xff]   ;;  %v2649_v8 = vld [vmem:[#allocation8 + $0x218] ss:$12 sps:$4 sm:$0xff]  }
 0x121   :  { %1437 = vmatpush1.bf16.msra.mxu1 %v2514_v5  ;;  %2402 = vmatprep.mubr.msk.f32.mxu1 %vm2849_vm0, %v2848_v0  ;;  %v2011_v11 = vadd.f32 -1.0, %v2676_v9  ;;  %v2641_v5 = vld [vmem:[#allocation8 + $0x8] ss:$12 sps:$4 sm:$0xff]   ;;  %v2651_v9 = vld [vmem:[#allocation8 + $0x2c0] ss:$12 sps:$4 sm:$0xff]  }
 0x122   :  { %1438 = vmatprep.subr.bf16.mxu1 %v2525_v7  ;;  %v2647_v7 = vld [vmem:[#allocation8 + $0x2d8] ss:$12 sps:$4 sm:$0xff]  }
 0x123   :  { %v225_v13 = vsel %vm213_vm3, %v204_v53, %v2011_v11  ;;  %v2624_v53 = vld [vmem:[#allocation8 + $0x98] ss:$12 sps:$4 sm:$0xff]   ;;  %v2655_v11 = vld [vmem:[#allocation8 + $0x2a8] ss:$12 sps:$4 sm:$0xff]  }
 0x124   :  { %v2678_v14 = vpop.eup %2677  ;;  %2403 = vmatmul.mubr.f32.gmra.mxu1 %v225_v13  ;;  %v2659_v13 = vld [vmem:[#allocation8 + $0x290] ss:$12 sps:$4 sm:$0xff]  }
 0x125   :  { %1439 = vmatpush1.bf16.msra.mxu1 %v2523_v10  ;;  %2405 = vmatprep.mubr.msk.f32.mxu1 %vm2849_vm0, %v2848_v0  ;;  %v2012_v16 = vadd.f32 -1.0, %v2678_v14  ;;  %v2653_v10 = vld [vmem:[#allocation8 + $0x200] ss:$12 sps:$4 sm:$0xff]  }
 0x126   :  { %1440 = vmatprep.subr.bf16.mxu1 %v2531_v12  ;;  %v2657_v12 = vld [vmem:[#allocation8 + $0x1e8] ss:$12 sps:$4 sm:$0xff]  }
 0x127   :  { %v226_v19 = vsel %vm214_vm4, %v209_v61, %v2012_v16  ;;  %v2633_v61 = vld [vmem:[#allocation8 + $0x110] ss:$12 sps:$4 sm:$0xff]   ;;  %v2665_v16 = vld [vmem:[#allocation8 + $0x1b8] ss:$12 sps:$4 sm:$0xff]  }
 0x128   :  { %2406 = vmatmul.mubr.f32.gmra.mxu1 %v226_v19 }
 0x129   :  { %1441 = vmatpush1.bf16.msra.mxu1 %v2529_v15  ;;  %1468 = vmatprep.mubr.bf16.mxu1 %v3000_v17 }
 0x12a   :  { %1442 = vmatprep.subr.bf16.mxu1 %v2537_v18  ;;  %v2667_v18 = vld [vmem:[#allocation8 + $0x260] ss:$12 sps:$4 sm:$0xff]  }
 0x12d   :  { %1443 = vmatpush1.bf16.msra.mxu1 %v2535_v20 }
 0x12e   :  { %1444 = vmatprep.subr.bf16.mxu1 %v2543_v21  ;;  %v2672_v21 = vld [vmem:[#allocation8 + $0x188] ss:$12 sps:$4 sm:$0xff]  }
 0x131   :  { %1445 = vmatpush1.bf16.msra.mxu1 %v2541_v22 }
 0x132   :  { %1446 = vmatprep.subr.bf16.mxu1 %v2549_v23  ;;  %v1758_v23 = vld [vmem:[#allocation10 + $0xf8] sm:$0xff] }
 0x135   :  { %1447 = vmatpush1.bf16.msra.mxu1 %v2547_v24 }
 0x136   :  { %1448 = vmatprep.subr.bf16.mxu1 %v2555_v27  ;;  %v1742_v27 = vld [vmem:[#allocation10 + $0x78] sm:$0xff] }
 0x139   :  { %1449 = vmatpush1.bf16.msra.mxu1 %v2553_v28 }
 0x13a   :  { %1450 = vmatprep.subr.bf16.mxu1 %v2561_v29  ;;  %v1757_v29 = vld [vmem:[#allocation10 + $0xf0] sm:$0xff] }
 0x13d   :  { %1451 = vmatpush1.bf16.msra.mxu1 %v2559_v30  ;;  %v1741_v30 = vld [vmem:[#allocation10 + $0x70] sm:$0xff] }
 0x13e   :  { %1452 = vmatprep.subr.bf16.mxu1 %v2567_v31 }
 0x141   :  { %1453 = vmatpush2.bf16.msra.mxu1 %v2565_v32  ;;  %v1756_v32 = vld [vmem:[#allocation10 + $0xe8] sm:$0xff] }
 0x142   :  { %1454 = vmatprep.subr.bf16.mxu1 %v2573_v33  ;;  %v1740_v33 = vld [vmem:[#allocation10 + $0x68] sm:$0xff] }
 0x145   :  { %1455 = vmatpush2.bf16.msra.mxu1 %v2571_v34  ;;  %v1755_v34 = vld [vmem:[#allocation10 + $0xe0] sm:$0xff] }
 0x146   :  { %1456 = vmatprep.subr.bf16.mxu1 %v2579_v35 }
 0x149   :  { %1457 = vmatpush2.bf16.msra.mxu1 %v2577_v36  ;;  %v1739_v36 = vld [vmem:[#allocation10 + $0x60] sm:$0xff] }
 0x14a   :  { %1458 = vmatprep.subr.bf16.mxu1 %v2585_v37  ;;  %v3019_v14 = vpop.f32.mrf.mxu0  ;;  %v1754_v37 = vld [vmem:[#allocation10 + $0xd8] sm:$0xff] }
 0x14c   :  { %v3021_v15 = vpop.f32.mrf.mxu0 }
 0x14d   :  { %1459 = vmatpush2.bf16.msra.mxu1 %v2583_v38 }
 0x14e   :  { %1460 = vmatprep.subr.bf16.mxu1 %v2591_v39  ;;  %v3023_v19 = vpop.f32.mrf.mxu0  ;;  %v1738_v39 = vld [vmem:[#allocation10 + $0x58] sm:$0xff] }
 0x150   :  { %v3025_v20 = vpop.f32.mrf.mxu0 }
 0x151   :  { %1461 = vmatpush2.bf16.msra.mxu1 %v2589_v40  ;;  %v1753_v40 = vld [vmem:[#allocation10 + $0xd0] sm:$0xff] }
 0x152   :  { %1462 = vmatprep.subr.bf16.mxu1 %v2597_v41  ;;  %v3027_v22 = vpop.f32.mrf.mxu0 }
 0x154   :  { %v3029_v24 = vpop.f32.mrf.mxu0 }
 0x155   :  { %1463 = vmatpush2.bf16.msra.mxu1 %v2595_v42  ;;  %v1737_v42 = vld [vmem:[#allocation10 + $0x50] sm:$0xff] }
 0x156   :  { %1464 = vmatprep.subr.bf16.mxu1 %v2603_v43  ;;  %v1433_v28 = vpop.f32.mrf.mxu0  ;;  %v1752_v43 = vld [vmem:[#allocation10 + $0xc8] sm:$0xff] }
 0x157   :  { %v1770_v28 = vld [vmem:[#allocation10 + $0x158] sm:$0xff] }
 0x158   :  { %v1434_v31 = vpop.f32.mrf.mxu0 }
 0x159   :  { %1465 = vmatpush2.bf16.msra.mxu1 %v2601_v44  ;;  %v1769_v31 = vld [vmem:[#allocation10 + $0x150] sm:$0xff] }
 0x15a   :  { %1466 = vmatprep.subr.bf16.mxu1 %v2611_v45  ;;  %v1736_v45 = vld [vmem:[#allocation10 + $0x48] sm:$0xff] }
 0x15d   :  { %1467 = vmatpush2.bf16.msra.mxu1 %v2609_v46  ;;  %v1751_v46 = vld [vmem:[#allocation10 + $0xc0] sm:$0xff] }
 0x15e   :  { %2206 = vmatprep.subr.bf16.mxu1 %v2618_v47 }
 0x160   :  { %1469 = vmatmul.mubr.bf16.vlgmr.msra.gmra.mxu1 %v3005_v49 }
 0x161   :  { %2207 = vmatpush3.bf16.msra.mxu1 %v2622_v50  ;;  %1478 = vmatprep.mubr.bf16.mxu1 %v3007_v51 }
 0x162   :  { %2208 = vmatprep.subr.bf16.mxu1 %v2623_v52  ;;  %v1749_v52 = vld [vmem:[#allocation10 + $0xb0] sm:$0xff] }
 0x165   :  { %2209 = vmatpush3.bf16.msra.mxu1 %v2624_v53 }
 0x166   :  { %2210 = vmatprep.subr.bf16.mxu1 %v2627_v54  ;;  %v1733_v54 = vld [vmem:[#allocation10 + $0x30] sm:$0xff] }
 0x168   :  { %1479 = vmatmul.mubr.bf16.gmra.mxu1 %v3011_v55 }
 0x169   :  { %2211 = vmatpush3.bf16.msra.mxu1 %v2629_v56  ;;  %1570 = vmatprep.mubr.bf16.mxu1 %v2976_v57  ;;  %v2645_v57 = vld [vmem:[#allocation8 + $0x230] ss:$12 sps:$4 sm:$0xff]  }
 0x16a   :  { %2212 = vmatprep.subr.bf16.mxu1 %v2631_v58  ;;  %v1732_v58 = vld [vmem:[#allocation10 + $0x28] sm:$0xff] }
 0x16d   :  { %2213 = vmatpush3.bf16.msra.mxu1 %v2632_v60  ;;  %v1747_v60 = vld [vmem:[#allocation10 + $0xa0] sm:$0xff] }
 0x16e   :  { %2214 = vmatprep.subr.bf16.mxu1 %v2633_v61  ;;  %v1731_v61 = vld [vmem:[#allocation10 + $0x20] sm:$0xff] }
 0x171   :  { %2215 = vmatpush3.bf16.msra.mxu1 %v2634_v62  ;;  %v1746_v62 = vld [vmem:[#allocation10 + $0x98] sm:$0xff] }
 0x172   :  { %2216 = vmatprep.subr.bf16.mxu1 %v2635_v63  ;;  %v1730_v63 = vld [vmem:[#allocation10 + $0x18] sm:$0xff] }
 0x175   :  { %2217 = vmatpush3.bf16.msra.mxu1 %v2636_v1  ;;  %v1745_v1 = vld [vmem:[#allocation10 + $0x90] sm:$0xff] }
 0x176   :  { %2218 = vmatprep.subr.bf16.mxu1 %v2637_v2  ;;  %v1729_v2 = vld [vmem:[#allocation10 + $0x10] sm:$0xff] }
 0x179   :  { %2219 = vmatpush3.bf16.msra.mxu1 %v2638_v3  ;;  %v1744_v3 = vld [vmem:[#allocation10 + $0x88] sm:$0xff] }
 0x17a   :  { %2220 = vmatprep.subr.bf16.mxu1 %v2639_v4  ;;  %v1728_v4 = vld [vmem:[#allocation10 + $0x8] sm:$0xff] }
 0x17d   :  { %2221 = vmatpush3.bf16.msra.mxu1 %v2641_v5  ;;  %v1743_v5 = vld [vmem:[#allocation10 + $0x80] sm:$0xff] }
 0x17e   :  { %2234 = vmatprep.subr.bf16.mxu1 %v2643_v6  ;;  %v1727_v6 = vld [vmem:[#allocation10] sm:$0xff] }
 0x180   :  { %1571 = vmatmul.mubr.bf16.vlgmr.msra.gmra.mxu1 %v2978_v59  ;;  %v2661_v59 = vld [vmem:[#allocation8 + $0x1d0] ss:$12 sps:$4 sm:$0xff]  }
 0x181   :  { %2235 = vmatpush3.bf16.msra.mxu1 %v2645_v57  ;;  %1578 = vmatprep.mubr.bf16.mxu1 %v2982_v25  ;;  %v2663_v25 = vld [vmem:[#allocation8 + $0x278] ss:$12 sps:$4 sm:$0xff]  }
 0x182   :  { %2236 = vmatprep.subr.bf16.mxu1 %v2647_v7  ;;  %v1774_v57 = vld [vmem:[#allocation10 + $0x178] sm:$0xff]  ;;  %v1773_v7 = vld [vmem:[#allocation10 + $0x170] sm:$0xff] }
 0x183   :  { %2409 = vmatpush3.msra.mxu0 %v1774_v57 }
 0x184   :  { %2410 = vmatprep.subr.mxu0 %v2848_v0 }
 0x185   :  { %2237 = vmatpush3.bf16.msra.mxu1 %v2649_v8  ;;  %2411 = vmatpush3.msra.mxu0 %v1773_v7 }
 0x186   :  { %2238 = vmatprep.subr.bf16.mxu1 %v2651_v9  ;;  %2412 = vmatprep.subr.mxu0 %v2848_v0  ;;  %v2013_v9 = vld [vmem:[%s3141_s6] ss:$0 sm:$0xff] }
 0x188   :  { %1579 = vmatmul.mubr.bf16.gmra.mxu1 %v2984_v26  ;;  %v2669_v26 = vld [vmem:[#allocation8 + $0x1a0] ss:$12 sps:$4 sm:$0xff]  }
 0x189   :  { %2239 = vmatpush3.bf16.msra.mxu1 %v2653_v10  ;;  %1618 = vmatprep.mubr.bf16.mxu1 %v3000_v17  ;;  %v2671_v17 = vld [vmem:[#allocation8 + $0x248] ss:$12 sps:$4 sm:$0xff]  }
 0x18a   :  { %2240 = vmatprep.subr.bf16.mxu1 %v2655_v11  ;;  %v3033_v35 = vpop.f32.mrf.mxu0 }
 0x18c   :  { %v3035_v38 = vpop.f32.mrf.mxu0 }
 0x18d   :  { %2241 = vmatpush3.bf16.msra.mxu1 %v2657_v12 }
 0x18e   :  { %2242 = vmatprep.subr.bf16.mxu1 %v2659_v13  ;;  %v3037_v41 = vpop.f32.mrf.mxu0 }
 0x190   :  { %v3040_v44 = vpop.f32.mrf.mxu0 }
 0x191   :  { %2243 = vmatpush3.bf16.msra.mxu1 %v2661_v59  ;;  %v1772_v59 = vld [vmem:[#allocation10 + $0x168] sm:$0xff] }
 0x192   :  { %2244 = vmatprep.subr.bf16.mxu1 %v2663_v25  ;;  %v3042_v47 = vpop.f32.mrf.mxu0  ;;  %2413 = vmatpush3.msra.mxu0 %v1772_v59 }
 0x193   :  { %2414 = vmatprep.subr.mxu0 %v2848_v0 }
 0x194   :  { %v3044_v50 = vpop.f32.mrf.mxu0 }
 0x195   :  { %2245 = vmatpush3.bf16.msra.mxu1 %v2665_v16 }
 0x196   :  { %2246 = vmatprep.subr.bf16.mxu1 %v2667_v18  ;;  %v1535_v53 = vpop.f32.mrf.mxu0 }
 0x197   :  { %v1762_v53 = vld [vmem:[#allocation10 + $0x118] sm:$0xff] }
 0x198   :  { %v1536_v56 = vpop.f32.mrf.mxu0 }
 0x199   :  { %2247 = vmatpush3.bf16.msra.mxu1 %v2669_v26  ;;  %v1759_v56 = vld [vmem:[#allocation10 + $0x100] sm:$0xff] }
 0x19a   :  { %2248 = vmatprep.subr.bf16.mxu1 %v2671_v17  ;;  %v1771_v17 = vld [vmem:[#allocation10 + $0x160] sm:$0xff] }
 0x19b   :  { %2415 = vmatpush3.msra.mxu0 %v1771_v17 }
 0x19c   :  { %2416 = vmatprep.subr.mxu0 %v2848_v0 }
 0x19d   :  { %2249 = vmatpush3.bf16.msra.mxu1 %v2672_v21  ;;  %2417 = vmatpush3.msra.mxu0 %v1770_v28 }
 0x19e   :  { %2290 = vmatprep.subr.mxu1 %v1758_v23  ;;  %2418 = vmatprep.subr.mxu0 %v2848_v0 }
 0x19f   :  { %2419 = vmatpush3.msra.mxu0 %v1769_v31 }
 0x1a0   :  { %1619 = vmatmul.mubr.bf16.vlgmr.msra.gmra.mxu1 %v3005_v49  ;;  %v1750_v49 = vld [vmem:[#allocation10 + $0xb8] sm:$0xff]  ;;  %2420 = vmatprep.subr.mxu0 %v2848_v0 }
 0x1a1   :  { %1626 = vmatprep.mubr.bf16.mxu1 %v3007_v51  ;;  %2291 = vmatpush3.msra.mxu1 %v1742_v27  ;;  %v1734_v51 = vld [vmem:[#allocation10 + $0x38] sm:$0xff] }
 0x1a2   :  { %2292 = vmatprep.subr.mxu1 %v1757_v29 }
 0x1a3   :  { %2293 = vmatpush3.msra.mxu1 %v1741_v30 }
 0x1a4   :  { %2294 = vmatprep.subr.mxu1 %v1756_v32 }
 0x1a5   :  { %2295 = vmatpush3.msra.mxu1 %v1740_v33 }
 0x1a6   :  { %2296 = vmatprep.subr.mxu1 %v1755_v34  ;;  %v1768_v34 = vld [vmem:[#allocation10 + $0x148] sm:$0xff] }
 0x1a7   :  { %2297 = vmatpush3.msra.mxu1 %v1739_v36  ;;  %2421 = vmatpush3.msra.mxu0 %v1768_v34 }
 0x1a8   :  { %1627 = vmatmul.mubr.bf16.gmra.mxu1 %v3011_v55  ;;  %2298 = vmatprep.subr.mxu1 %v1754_v37  ;;  %v1748_v55 = vld [vmem:[#allocation10 + $0xa8] sm:$0xff] }
 0x1a9   :  { %2299 = vmatpush3.msra.mxu1 %v1738_v39  ;;  %2422 = vmatprep.subr.mxu0 %v2848_v0 }
 0x1aa   :  { %2300 = vmatprep.subr.mxu1 %v1753_v40  ;;  %v2278_v8 = vpop.f32.mrf.mxu0  ;;  %v1767_v40 = vld [vmem:[#allocation10 + $0x140] sm:$0xff] }
 0x1ab   :  { %2301 = vmatpush3.msra.mxu1 %v1737_v42  ;;  %2423 = vmatpush3.msra.mxu0 %v1767_v40 }
 0x1ac   :  { %2302 = vmatprep.subr.mxu1 %v1752_v43  ;;  %v2279_v10 = vpop.f32.mrf.mxu0  ;;  %2424 = vmatprep.subr.mxu0 %v2848_v0  ;;  %v1766_v43 = vld [vmem:[#allocation10 + $0x138] sm:$0xff] }
 0x1ad   :  { %2303 = vmatpush3.msra.mxu1 %v1736_v45  ;;  %v3051_v11 = vadd.f32 %v2279_v10, %v2278_v8  ;;  %2425 = vmatpush3.msra.mxu0 %v1766_v43 }
 0x1ae   :  { %2304 = vmatprep.subr.mxu1 %v1751_v46  ;;  %v2281_v13 = vpop.f32.mrf.mxu0  ;;  %2426 = vmatprep.subr.mxu0 %v2848_v0  ;;  %v1765_v46 = vld [vmem:[#allocation10 + $0x130] sm:$0xff] }
 0x1af   :  { %2305 = vmatpush3.msra.mxu1 %v1735_v48  ;;  %2427 = vmatpush3.msra.mxu0 %v1765_v46 }
 0x1b0   :  { %2306 = vmatprep.subr.mxu1 %v1750_v49  ;;  %v2282_v26 = vpop.f32.mrf.mxu0  ;;  %2428 = vmatprep.subr.mxu0 %v2848_v0  ;;  %v1764_v49 = vld [vmem:[#allocation10 + $0x128] sm:$0xff] }
 0x1b1   :  { %2307 = vmatpush3.msra.mxu1 %v1734_v51  ;;  %v3058_v23 = vadd.f32 %v2282_v26, %v2281_v13  ;;  %2429 = vmatpush3.msra.mxu0 %v1764_v49 }
 0x1b2   :  { %2308 = vmatprep.subr.mxu1 %v1749_v52  ;;  %v2284_v39 = vpop.f32.mrf.mxu0  ;;  %2430 = vmatprep.subr.mxu0 %v2848_v0  ;;  %v1763_v52 = vld [vmem:[#allocation10 + $0x120] sm:$0xff] }
 0x1b3   :  { %2309 = vmatpush3.msra.mxu1 %v1733_v54  ;;  %2431 = vmatpush3.msra.mxu0 %v1763_v52  ;;  %v1761_v54 = vld [vmem:[#allocation10 + $0x110] sm:$0xff] }
 0x1b4   :  { %2310 = vmatprep.subr.mxu1 %v1748_v55  ;;  %v2285_v42 = vpop.f32.mrf.mxu0  ;;  %2432 = vmatprep.subr.mxu0 %v2848_v0  ;;  %v1760_v55 = vld [vmem:[#allocation10 + $0x108] sm:$0xff] }
 0x1b5   :  { %2311 = vmatpush3.msra.mxu1 %v1732_v58  ;;  %v3073_v45 = vadd.f32 %v2285_v42, %v2284_v39  ;;  %2433 = vmatpush3.msra.mxu0 %v1762_v53  ;;  %v551_v58 = vlaneseq }
 0x1b6   :  { %2312 = vmatprep.subr.mxu1 %v1747_v60  ;;  %v2287_v48 = vpop.f32.mrf.mxu0  ;;  %2434 = vmatprep.subr.mxu0 %v2848_v0 }
 0x1b7   :  { %2313 = vmatpush3.msra.mxu1 %v1731_v61  ;;  %2435 = vmatpush3.msra.mxu0 %v1761_v54  ;;  %v3082_v60 = vshrl.u32 %v551_v58, 7 }
 0x1b8   :  { %2314 = vmatprep.subr.mxu1 %v1746_v62  ;;  %v2288_v51 = vpop.f32.mrf.mxu0  ;;  %2436 = vmatprep.subr.mxu0 %v2848_v0  ;;  %v3088_v62 = vld [vmem:[%s3143_s8] sm:$0x7] }
 0x1b9   :  { %2315 = vmatpush3.msra.mxu1 %v1730_v63  ;;  %2437 = vmatpush3.msra.mxu0 %v1760_v55  ;;  %v553_v61 = vsub.s32 0, %v3082_v60  ;;  %v557_v63 = vsub.s32 1, %v3082_v60 }
 0x1ba   :  { %2316 = vmatprep.subr.mxu1 %v1745_v1  ;;  %2438 = vmatprep.subr.mxu0 %v2848_v0 }
 0x1bb   :  { %2317 = vmatpush3.msra.mxu1 %v1729_v2  ;;  %2439 = vmatpush3.msra.mxu0 %v1759_v56  ;;  %v554_v1 = vrot.slane %v3088_v62, %v553_v61  ;;  %v558_v2 = vrot.slane %v3088_v62, %v557_v63 }
 0x1bc   :  { %2318 = vmatprep.subr.mxu1 %v1744_v3 }
 0x1bd   :  { %2319 = vmatpush3.msra.mxu1 %v1728_v4  ;;  %v1420_v3 = vadd.f32 %v3019_v14, %v554_v1  ;;  %v1424_v7 = vadd.f32 %v3023_v19, %v554_v1  ;;  %v1426_v10 = vadd.f32 %v3025_v20, %v558_v2  ;;  %v1430_v13 = vadd.f32 %v3027_v22, %v554_v1 }
 0x1be   :  { %2320 = vmatprep.subr.mxu1 %v1743_v5  ;;  %v1422_v5 = vadd.f32 %v3021_v15, %v558_v2  ;;  %v1432_v14 = vadd.f32 %v3029_v24, %v558_v2 }
 0x1bf   :  { %2321 = vmatpush3.msra.mxu1 %v1727_v6 }
 0x1e0   :  { %v316_v12 = vpop.f32.mrf.mxu1 }
 0x1e1   :  { %v3053_v25 = vadd.f32 %v2013_v9, %v316_v12 }
 0x1e2   :  { %v2401_v16 = vpop.f32.mrf.mxu1 }
 0x1e3   :  { %v330_v18 = vmul.f32 %v3053_v25, %v3053_v25 }
 0x1e4   :  { %v321_v21 = vpop.f32.mrf.mxu1 }
 0x1e5   :  { %v3060_v27 = vadd.f32 %v2013_v9, %v321_v21  ;;  %333 = vadd.xlane.f32.xlu0 %v330_v18 }
 0x1e6   :  { %v2404_v29 = vpop.f32.mrf.mxu1 }
 0x1e7   :  { %v331_v30 = vmul.f32 %v3060_v27, %v3060_v27 }
 0x1e8   :  { %v326_v32 = vpop.f32.mrf.mxu1 }
 0x1e9   :  { %v3066_v33 = vadd.f32 %v2013_v9, %v326_v32  ;;  %335 = vadd.xlane.f32.xlu0 %v331_v30 }
 0x1ea   :  { %v2407_v36 = vpop.f32.mrf.mxu1 }
 0x1eb   :  { %v332_v37 = vmul.f32 %v3066_v33, %v3066_v33 }
 0x1ed   :  { %337 = vadd.xlane.f32.xlu1 %v332_v37 }
 0x220   :  { %v1470_v4 = vpop.f32.mrf.mxu1 }
 0x221   :  { %v1471_v6 = vadd.f32 %v1470_v4, %v1420_v3 }
 0x222   :  { %v1472_v57 = vpop.f32.mrf.mxu1 }
 0x223   :  { %v1473_v8 = vadd.f32 %v1472_v57, %v1422_v5  ;;  %v1522_v9 = vadd.f32 %v3033_v35, %v1471_v6  ;;  %v561_v6 = vsub.s32 2, %v3082_v60 }
 0x224   :  { %v1474_v12 = vpop.f32.mrf.mxu1 }
 0x225   :  { %v1691_v59 = vmul.f32 1.442695, %v1522_v9  ;;  %v1475_v16 = vadd.f32 %v1474_v12, %v1424_v7  ;;  %v1524_v18 = vadd.f32 %v3035_v38, %v1473_v8  ;;  %vm1682_vm6 = vcmp.gt.f32.partialorder %v1522_v9, 0.0 }
 0x226   :  { %v1476_v26 = vpop.f32.mrf.mxu1  ;;  %v562_v57 = vrot.slane %v3088_v62, %v561_v6 }
 0x227   :  { %2679 = vpow2.f32 %v1691_v59  ;;  %v1693_v15 = vmul.f32 1.442695, %v1524_v18  ;;  %v1477_v17 = vadd.f32 %v1476_v26, %v1426_v10  ;;  %v1526_v19 = vadd.f32 %v3037_v41, %v1475_v16 }
 0x228   :  { %v1480_v21 = vpop.f32.mrf.mxu1  ;;  %vm1683_vm5 = vcmp.gt.f32.partialorder %v1524_v18, 0.0 }
 0x229   :  { %2681 = vpow2.f32 %v1693_v15  ;;  %v1697_v35 = vmul.f32 1.442695, %v1526_v19  ;;  %v1481_v28 = vadd.f32 %v1480_v21, %v1430_v13  ;;  %v1528_v20 = vadd.f32 %v3040_v44, %v1477_v17 }
 0x22a   :  { %v1482_v29 = vpop.f32.mrf.mxu1  ;;  %vm1685_vm8 = vcmp.gt.f32.partialorder %v1526_v19, 0.0 }
 0x22b   :  { %2683 = vpow2.f32 %v1697_v35  ;;  %v1699_v22 = vmul.f32 1.442695, %v1528_v20  ;;  %v1483_v30 = vadd.f32 %v1482_v29, %v1432_v14  ;;  %v1532_v38 = vadd.f32 %v3042_v47, %v1481_v28 }
 0x22c   :  { %v1484_v31 = vpop.f32.mrf.mxu1  ;;  %vm1686_vm7 = vcmp.gt.f32.partialorder %v1528_v20, 0.0 }
 0x22d   :  { %2685 = vpow2.f32 %v1699_v22  ;;  %v1703_v24 = vmul.f32 1.442695, %v1532_v38  ;;  %v1534_v32 = vadd.f32 %v3044_v50, %v1483_v30  ;;  %vm1688_vm9 = vcmp.gt.f32.partialorder %v1532_v38, 0.0 }
 0x22e   :  { %v1485_v34 = vpop.f32.mrf.mxu1 }
 0x22f   :  { %2687 = vpow2.f32 %v1703_v24  ;;  %v1705_v41 = vmul.f32 1.442695, %v1534_v32  ;;  %vm1689_vm10 = vcmp.gt.f32.partialorder %v1534_v32, 0.0 }
 0x231   :  { %2689 = vpow2.f32 %v1705_v41 }
 0x234   :  { %v2680_v36 = vpop.eup %2679 }
 0x235   :  { %v2170_v39 = vadd.f32 -1.0, %v2680_v36 }
 0x236   :  { %v2682_v37 = vpop.eup %2681 }
 0x237   :  { %v2171_v40 = vadd.f32 -1.0, %v2682_v37  ;;  %v1718_v46 = vsel %vm1682_vm6, %v1522_v9, %v2170_v39 }
 0x238   :  { %v2684_v44 = vpop.eup %2683 }
 0x239   :  { %v1719_v42 = vsel %vm1683_vm5, %v1524_v18, %v2171_v40  ;;  %v2173_v47 = vadd.f32 -1.0, %v2684_v44  ;;  %v2850_v40 = vmov 0  }
 0x23a   :  { %v2686_v43 = vpop.eup %2685  ;;  %1846 = vmatprep.mubr.f32.mxu1 %v1719_v42  ;;  %2465 = vset.pattern.permute.xlu1 %v2850_v40 }
 0x23b   :  { %1847 = vmatmul.mubr.f32.vlgmr.msra.gmra.mxu1 %v1718_v46  ;;  %v2174_v48 = vadd.f32 -1.0, %v2686_v43  ;;  %v1721_v52 = vsel %vm1685_vm8, %v1526_v19, %v2173_v47  ;;  %2464 = vset.pattern.permute.xlu0 %v2850_v40 }
 0x23c   :  { %v2688_v49 = vpop.eup %2687 }
 0x23d   :  { %v1722_v50 = vsel %vm1686_vm7, %v1528_v20, %v2174_v48  ;;  %v2176_v53 = vadd.f32 -1.0, %v2688_v49  ;;  %v2179_v48 = vld [vmem:[%s3145_s10] ss:$0 sm:$0xff] }
 0x23e   :  { %v2690_v51 = vpop.eup %2689  ;;  %1851 = vmatprep.mubr.f32.mxu1 %v1722_v50 }
 0x23f   :  { %1852 = vmatmul.mubr.f32.gmra.mxu1 %v1721_v52  ;;  %v2177_v54 = vadd.f32 -1.0, %v2690_v51  ;;  %v1724_v61 = vsel %vm1688_vm9, %v1532_v38, %v2176_v53 }
 0x240   :  { %v2222_v55 = vpop.f32.mrf.mxu1 }
 0x241   :  { %v1725_v56 = vsel %vm1689_vm10, %v1534_v32, %v2177_v54 }
 0x242   :  { %v2223_v58 = vpop.f32.mrf.mxu1  ;;  %1856 = vmatprep.mubr.f32.mxu1 %v1725_v56 }
 0x243   :  { %1857 = vmatmul.mubr.f32.gmra.mxu1 %v1724_v61  ;;  %v2224_v7 = vadd.f32 %v2223_v58, %v2222_v55 }
 0x244   :  { %v2225_v63 = vpop.f32.mrf.mxu1 }
 0x245   :  { %v1573_v10 = vadd.f32 %v2224_v7, %v562_v57 }
 0x246   :  { %v2226_v1 = vpop.f32.mrf.mxu1 }
 0x247   :  { %v2227_v12 = vadd.f32 %v2226_v1, %v2225_v63 }
 0x248   :  { %v2228_v2 = vpop.f32.mrf.mxu1 }
 0x249   :  { %v1576_v14 = vadd.f32 %v2227_v12, %v562_v57 }
 0x24a   :  { %v2229_v3 = vpop.f32.mrf.mxu1 }
 0x24b   :  { %v2230_v26 = vadd.f32 %v2229_v3, %v2228_v2  ;;  %v1961_v2 = vld [vmem:[%s3137_s2 + $0x8] sm:$0xff]  ;;  %v1960_v3 = vld [vmem:[%s3137_s2] sm:$0xff] }
 0x24c   :  { %v2231_v4 = vpop.f32.mrf.mxu1 }
 0x24d   :  { %v1581_v28 = vadd.f32 %v2230_v26, %v562_v57 }
 0x24e   :  { %v2232_v5 = vpop.f32.mrf.mxu1 }
 0x260   :  { %v2250_v8 = vpop.f32.mrf.mxu1 }
 0x262   :  { %v2251_v9 = vpop.f32.mrf.mxu1 }
 0x263   :  { %v2252_v13 = vadd.f32 %v2251_v9, %v2250_v8  ;;  %v1962_v9 = vld [vmem:[%s3137_s2 + $0x10] sm:$0xff]  ;;  %s2851_s2 = smov [#allocation11]  }
 0x264   :  { %v2253_v59 = vpop.f32.mrf.mxu1  ;;  %s1992_s22 = sshll.u32 %s2851_s2, 4  ;;  %s1993_s22 = int_to_ptr.vmem [resolvable:$true] %s1992_s22 }
 0x265   :  { %v1621_v16 = vadd.f32 %v2252_v13, %v1573_v10  ;;  %s2809_s23 = scalar_lea.vmem %s1993_s22, 384  ;;  %p2814_p12 = scmp.lt.s32.totalorder %s1993_s22, %s1993_s22 }
 0x266   :  { %v2254_v18 = vpop.f32.mrf.mxu1  ;;  %p2810_p11 = scmp.ne.s32.totalorder %s1993_s22, %s2809_s23  ;;  %p2815_p13 = scmp.lt.s32.totalorder %s2809_s23, %s2809_s23 }
 0x267   :  { %v1669_v15 = vadd.f32 %v3051_v11, %v1621_v16  ;;  %v2255_v17 = vadd.f32 %v2254_v18, %v2253_v59 }
 0x268   :  { %v2256_v19 = vpop.f32.mrf.mxu1  ;;  %p2816_p0 = por %p2815_p13, %p2814_p12 }
 0x269   :  { %v1695_v21 = vmul.f32 1.442695, %v1669_v15  ;;  %v1624_v35 = vadd.f32 %v2255_v17, %v1576_v14  ;;  %vm1684_vm11 = vcmp.gt.f32.partialorder %v1669_v15, 0.0 }
 0x26a   :  { %v2257_v60 = vpop.f32.mrf.mxu1  ;;  %p2817_p1 = pnand %p2816_p0, %p2810_p11 }
 0x26b   :  { %2691 = vpow2.f32 %v1695_v21  ;;  %v1672_v62 = vadd.f32 %v3058_v23, %v1624_v35  ;;  %v2258_v20 = vadd.f32 %v2257_v60, %v2256_v19 }
 0x26c   :  { %v2259_v29 = vpop.f32.mrf.mxu1 }
 0x26d   :  { %v1701_v22 = vmul.f32 1.442695, %v1672_v62  ;;  %v1629_v30 = vadd.f32 %v2258_v20, %v1581_v28  ;;  %vm1687_vm12 = vcmp.gt.f32.partialorder %v1672_v62, 0.0 }
 0x26e   :  { %v2260_v38 = vpop.f32.mrf.mxu1  ;;  %v334_v10 = vpop.xlane.xlu0 %333 }
 0x26f   :  { %2693 = vpow2.f32 %v1701_v22  ;;  %v1677_v31 = vadd.f32 %v3073_v45, %v1629_v30  ;;  %v339_v13 = vmax.f32 %v334_v10, 1e-24 }
 0x271   :  { %v1707_v24 = vmul.f32 1.442695, %v1677_v31  ;;  %vm1690_vm13 = vcmp.gt.f32.partialorder %v1677_v31, 0.0 }
 0x272   :  { %v336_v59 = vpop.xlane.xlu0 %335 }
 0x273   :  { %2695 = vpow2.f32 %v1707_v24  ;;  %v340_v18 = vmax.f32 %v336_v59, 1e-24 }
 0x274   :  { %2697 = vrsqrt.f32 %v339_v13 }
 0x276   :  { %v338_v12 = vpop.xlane.xlu1 %337 }
 0x278   :  { %v2692_v11 = vpop.eup %2691 }
 0x279   :  { %v2172_v32 = vadd.f32 -1.0, %v2692_v11  ;;  %v341_v11 = vmax.f32 %v338_v12, 1e-24 }
 0x27b   :  { %v1720_v34 = vsel %vm1684_vm11, %v1669_v15, %v2172_v32 }
 0x27c   :  { %v2694_v41 = vpop.eup %2693  ;;  %2441 = vmatmul.mubr.f32.vlgmr.msra.gmra.mxu0 %v1720_v34 }
 0x27d   :  { %2443 = vmatprep.mubr.msk.f32.mxu0 %vm2849_vm0, %v2848_v0  ;;  %v2175_v23 = vadd.f32 -1.0, %v2694_v41 }
 0x27f   :  { %v1723_v36 = vsel %vm1687_vm12, %v1672_v62, %v2175_v23 }
 0x280   :  { %v2696_v37 = vpop.eup %2695  ;;  %2444 = vmatmul.mubr.f32.gmra.mxu0 %v1723_v36 }
 0x281   :  { %2446 = vmatprep.mubr.msk.f32.mxu0 %vm2849_vm0, %v2848_v0  ;;  %v2178_v45 = vadd.f32 -1.0, %v2696_v37  ;;  %v2698_v17 = vpop.eup %2697 }
 0x282   :  { %v345_v21 = vmul.f32 %v2698_v17, %v3053_v25 }
 0x283   :  { %v1726_v39 = vsel %vm1690_vm13, %v1677_v31, %v2178_v45 }
 0x284   :  { %2447 = vmatmul.mubr.f32.gmra.mxu0 %v1726_v39 }
 0x2fb   :  { %v2322_v44 = vpop.f32.mrf.mxu1 }
 0x2fd   :  { %v2323_v42 = vpop.f32.mrf.mxu1 }
 0x2fe   :  { %v2324_v46 = vadd.f32 %v2323_v42, %v2322_v44 }
 0x2ff   :  { %v2325_v43 = vpop.f32.mrf.mxu1 }
 0x300   :  { %v1849_v50 = vadd.f32 %v2324_v46, %v2179_v48 }
 0x301   :  { %v2326_v47 = vpop.f32.mrf.mxu1 }
 0x302   :  { %v2327_v49 = vadd.f32 %v2326_v47, %v2325_v43 }
 0x303   :  { %v2328_v4 = vpop.f32.mrf.mxu1 }
 0x304   :  { %v1854_v53 = vadd.f32 %v2327_v49, %v2179_v48 }
 0x305   :  { %v2329_v5 = vpop.f32.mrf.mxu1 }
 0x306   :  { %v2330_v6 = vadd.f32 %v2329_v5, %v2328_v4 }
 0x308   :  { %v1859_v57 = vadd.f32 %v2330_v6, %v2179_v48 }
 0x33c   :  { %v1928_v51 = vpop.f32.mrf.mxu0 }
 0x33d   :  { %v1929_v0 = vadd.f32 %v1928_v51, %v1849_v50 }
 0x33e   :  { %v2442_v52 = vpop.f32.mrf.mxu0 }
 0x33f   :  { %v1942_v54 = vmul.f32 %v1929_v0, %v1929_v0 }
 0x340   :  { %v1933_v55 = vpop.f32.mrf.mxu0 }
 0x341   :  { %v1934_v56 = vadd.f32 %v1933_v55, %v1854_v53  ;;  %1945 = vadd.xlane.f32.xlu1 %v1942_v54 }
 0x342   :  { %v2445_v58 = vpop.f32.mrf.mxu0 }
 0x343   :  { %v1943_v61 = vmul.f32 %v1934_v56, %v1934_v56 }
 0x344   :  { %v1938_v63 = vpop.f32.mrf.mxu0 }
 0x345   :  { %1947 = vadd.xlane.f32.xlu0 %v1943_v61  ;;  %v1939_v7 = vadd.f32 %v1938_v63, %v1859_v57 }
 0x346   :  { %v2448_v1 = vpop.f32.mrf.mxu0 }
 0x347   :  { %v1944_v8 = vmul.f32 %v1939_v7, %v1939_v7 }
 0x352   :  { %1973 = vperm.xlu1 %2465, %v1961_v2  }
 0x35b   :  { %1968 = vperm.xlu0 %2464, %v1960_v3  }
 0x376   :  { %1949 = vadd.xlane.f32.xlu1 %v1944_v8 }
 0x387   :  { %1978 = vperm.xlu1 %2465, %v1962_v9  }
 0x3ca   :  { %v1946_v16 = vpop.xlane.xlu1 %1945 }
 0x3cb   :  { %v1951_v14 = vmax.f32 %v1946_v16, 1e-24 }
 0x3cd   :  { %2699 = vrsqrt.f32 %v1951_v14 }
 0x3ce   :  { %v1948_v26 = vpop.xlane.xlu0 %1947  ;;  %2701 = vrsqrt.f32 %v340_v18  ;;  %v1974_v31 = vpop.permute.xlu1 %1973 }
 0x3cf   :  { %v1952_v15 = vmax.f32 %v1948_v26, 1e-24 }
 0x3d1   :  { %2703 = vrsqrt.f32 %v1952_v15 }
 0x3d2   :  { %2705 = vrsqrt.f32 %v341_v11 }
 0x3d6   :  { %v1969_v28 = vpop.permute.xlu0 %1968 }
 0x3da   :  { %v2700_v19 = vpop.eup %2699 }
 0x3db   :  { %v1957_v35 = vmul.f32 %v2700_v19, %v1929_v0  ;;  %v2702_v60 = vpop.eup %2701 }
 0x3dc   :  { %v346_v29 = vmul.f32 %v2702_v60, %v3060_v27 }
 0x3dd   :  { %v1963_v62 = vadd.f32 %v1957_v35, %v345_v21 }
 0x3de   :  { %v2704_v20 = vpop.eup %2703 }
 0x3df   :  { %v1958_v22 = vmul.f32 %v2704_v20, %v1934_v56  ;;  %v1981_v30 = vmul.f32 %v1969_v28, %v1963_v62  ;;  %v2706_v25 = vpop.eup %2705 }
 0x3e0   :  { %v347_v23 = vmul.f32 %v2706_v25, %v3066_v33 }
 0x3e1   :  { %v1964_v38 = vadd.f32 %v1958_v22, %v346_v29  ;;  %1984 = vst [vmem:[#allocation11] sm:$0xff] %v1981_v30 }
 0x3e3   :  { %v1982_v24 = vmul.f32 %v1974_v31, %v1964_v38 }
 0x3e5   :  { %1985 = vst [vmem:[#allocation11 + $0x8] sm:$0xff] %v1982_v24 }
 0x3ff   :  { %v1950_v32 = vpop.xlane.xlu1 %1949 }
 0x400   :  { %v1953_v34 = vmax.f32 %v1950_v32, 1e-24 }
 0x402   :  { %2707 = vrsqrt.f32 %v1953_v34 }
 0x403   :  { %v1979_v37 = vpop.permute.xlu1 %1978 }
 0x40f   :  { %v2708_v41 = vpop.eup %2707 }
 0x410   :  { %v1959_v36 = vmul.f32 %v2708_v41, %v1939_v7 }
 0x412   :  { %v1965_v27 = vadd.f32 %v1959_v36, %v347_v23 }
 0x414   :  { %v1983_v45 = vmul.f32 %v1979_v37, %v1965_v27 }
 0x416   :  { %1986 = vst [vmem:[#allocation11 + $0x10] sm:$0xff] %v1983_v45 }
 0x417   :  { %2820 = shalt.err (!%p2817_p1)
}
 0x418   :  { %1998 = dma.vmem_to_hbm [thread:$0]  %s1993_s22, 384, %s3146_s11, [#allocation4], %s2838_s20, %s2838_s20, %s2839_s21  }
 0x419   :  { %2835 = dma.done.wait [#allocation4], 384  }
 0x41a   :  { %2836 = vsyncadd [#allocation4], 4294966912 }
 0x41b   :  { %2002 = vsyncpa [#allocation3], 1 }
 0x41c   :  { %2003 = vsyncpa [#allocation6], 1 }
 0x41d   :  { %2004 = vsyncpa [#allocation9], 1 }
 0x41e   :  { %2005 = vsyncpa [#allocation4], 1 }

</bundles_post_ra>
